<compile_context>
chip_gen: v7x
topology: tpu7x:2x2x1
jax: 0.10.0
libtpu: 0.0.40
codegen_flags: <defaults>
</compile_context>

<pallas_src>
import functools
import math

import jax
import jax.numpy as jnp
import numpy as np
from jax.experimental import pallas as pl
from jax.experimental.pallas import tpu as pltpu

# Small shapes consistent with the PyTorch module (d_model 512->128, d_ff 2048->256,
# seq 10->8, num_heads kept at 8, batch kept at 2).
B = 2
T = 8
D_MODEL = 128                 # == 128 lanes -> lane-dense activations and output
NUM_HEADS = 8
D_K = D_MODEL // NUM_HEADS
D_FF = 256
LN_EPS = 1e-5                 # nn.LayerNorm default


def encoder_block_kernel(x_ref, wqkv_ref, bqkv_ref, wo_ref, bo_ref,
                         g1_ref, be1_ref, w1_ref, b1_ref, w2_ref, b2_ref,
                         g2_ref, be2_ref, o_ref, *, num_heads):
    bb, t, c = x_ref.shape
    nh = num_heads
    dk = c // nh

    # ---- hoist all parameter loads (each ref read exactly once) ----
    wqkv = wqkv_ref[...]          # (C, 3C)  bf16, Q columns pre-scaled by 1/sqrt(Dk)
    bqkv = bqkv_ref[...]          # (1, 3C)  f32, Q part pre-scaled
    wo = wo_ref[...]              # (C, C)   bf16
    bo = bo_ref[...]              # (1, C)   f32
    g1 = g1_ref[...]; be1 = be1_ref[...]
    w1 = w1_ref[...]; b1 = b1_ref[...]
    w2 = w2_ref[...]; b2 = b2_ref[...]
    g2 = g2_ref[...]; be2 = be2_ref[...]

    x = x_ref[...]                            # (bb, T, C) f32
    x2d = x.reshape(bb * t, c)                # (bb*T, C) lane-dense

    # ---- fused QKV projection: ONE bf16 (bb*T, C) @ (C, 3C) MXU matmul ----
    qkv = jnp.dot(x2d.astype(jnp.bfloat16), wqkv,
                  preferred_element_type=jnp.float32) + bqkv       # (bb*T, 3C) f32

    q2d = qkv[:, 0 * c:1 * c]                 # 128-lane-aligned slices (cheap)
    k2d = qkv[:, 1 * c:2 * c]
    v2d = qkv[:, 2 * c:3 * c]

    # ---- head relayout (bb*T, H*Dk) -> (bb*H, T, Dk) via static slices + stack ----
    def split_heads(z2d):
        parts = []
        for b in range(bb):                    # static, tiny (bb=2)
            zb = z2d[b * t:(b + 1) * t, :]     # sublane-tile aligned slice
            for h in range(nh):
                parts.append(zb[:, h * dk:(h + 1) * dk])   # 16-lane static slice
        return jnp.stack(parts, axis=0)        # (bb*H, T, Dk)

    q = split_heads(q2d).astype(jnp.bfloat16)
    k = split_heads(k2d).astype(jnp.bfloat16)
    v = split_heads(v2d).astype(jnp.bfloat16)

    # ---- attention: single dot_generals batched over all bb*H heads ----
    # scores contract Dk of q and k directly (no k transpose); scale already folded.
    s = jax.lax.dot_general(q, k, (((2,), (2,)), ((0,), (0,))),
                            preferred_element_type=jnp.float32)    # (bb*H, T, T)
    m = jnp.max(s, axis=-1, keepdims=True)
    e = jnp.exp(s - m)                                             # one EUP pass
    denom = jnp.sum(e, axis=-1, keepdims=True)
    p = (e * pl.reciprocal(denom, approx=True)).astype(jnp.bfloat16)
    a = jax.lax.dot_general(p, v, (((2,), (1,)), ((0,), (0,))),
                            preferred_element_type=jnp.float32)    # (bb*H, T, Dk)

    # ---- merge heads back to (bb*T, C) once, then ONE K=128 out-projection ----
    rows = []
    for b in range(bb):
        rows.append(jnp.concatenate([a[b * nh + h] for h in range(nh)], axis=-1))
    concat2d = jnp.concatenate(rows, axis=0) if bb > 1 else rows[0]  # (bb*T, C)
    attn2d = jnp.dot(concat2d.astype(jnp.bfloat16), wo,
                     preferred_element_type=jnp.float32) + bo         # (bb*T, C)

    # ---- residual + LayerNorm 1 (lane-dense (bb*T, C)) ----
    hpre = x2d + attn2d
    mu = jnp.mean(hpre, axis=-1, keepdims=True)
    d = hpre - mu
    var = jnp.mean(d * d, axis=-1, keepdims=True)
    h1 = d * jax.lax.rsqrt(var + LN_EPS) * g1 + be1

    # ---- position-wise FFN (bf16 matmuls, f32 accumulate) ----
    f = jnp.dot(h1.astype(jnp.bfloat16), w1, preferred_element_type=jnp.float32) + b1
    f = jnp.maximum(f, 0.0)
    f = jnp.dot(f.astype(jnp.bfloat16), w2, preferred_element_type=jnp.float32) + b2

    # ---- residual + LayerNorm 2 ----
    h2 = h1 + f
    mu2 = jnp.mean(h2, axis=-1, keepdims=True)
    d2 = h2 - mu2
    var2 = jnp.mean(d2 * d2, axis=-1, keepdims=True)
    y = d2 * jax.lax.rsqrt(var2 + LN_EPS) * g2 + be2

    o_ref[...] = y.reshape(bb, t, c)


def _replicated_spec(shape):
    n = len(shape)
    return pl.BlockSpec(shape, lambda i, _n=n: (0,) * _n)


@jax.jit
def transformer_encoder_block(x, kparams):
    (wqkv, bqkv, wo, bo, g1, be1, w1, b1, w2, b2, g2, be2) = kparams
    bsz, seq, c = x.shape
    nh = NUM_HEADS
    dk = c // nh
    dff = w1.shape[1]

    flops = (2 * bsz * seq * c * 3 * c          # fused QKV projection
             + 2 * bsz * nh * seq * seq * dk    # Q.K^T
             + 2 * bsz * nh * seq * seq * dk    # P.V
             + 2 * bsz * seq * c * c            # out projection
             + 4 * bsz * seq * c * dff)         # FFN (both layers)
    transcendentals = bsz * nh * seq * seq + bsz * nh * seq + 4 * bsz * seq
    bytes_accessed = (4 * 2 * x.size
                      + sum(int(p.size) * p.dtype.itemsize for p in kparams))
    cost = pl.CostEstimate(flops=flops, transcendentals=transcendentals,
                           bytes_accessed=bytes_accessed)

    # Whole batch per invocation (single grid step): at B=2/T=8 per-core work is
    # sub-microsecond, so splitting across TensorCores only duplicates parameter
    # DMA and launch overhead.  Replicated params are fetched exactly once.
    grid_spec = pltpu.PrefetchScalarGridSpec(
        num_scalar_prefetch=0,
        grid=(1,),
        in_specs=[pl.BlockSpec((bsz, seq, c), lambda i: (0, 0, 0))] +
                 [_replicated_spec(p.shape) for p in kparams],
        out_specs=pl.BlockSpec((bsz, seq, c), lambda i: (0, 0, 0)),
    )
    kernel = functools.partial(encoder_block_kernel, num_heads=nh)
    return pl.pallas_call(
        kernel,
        out_shape=jax.ShapeDtypeStruct((bsz, seq, c), jnp.float32),
        grid_spec=grid_spec,
        compiler_params=pltpu.CompilerParams(dimension_semantics=("arbitrary",)),
        cost_estimate=cost,
    )(x, *kparams)


def prepare_params(params):
    """Host-side layout plumbing: 1/sqrt(Dk) folded into the Q columns of the fused
    QKV weight/bias; matmul weights cast to bf16 (MXU-native); biases/LN stay f32."""
    (wqkv, bqkv, wo, bo, g1, be1, w1, b1, w2, b2, g2, be2) = params
    c = wqkv.shape[0]
    dk = c // NUM_HEADS
    scale = 1.0 / math.sqrt(dk)
    scale_vec = jnp.concatenate([jnp.full((c,), scale, jnp.float32),
                                 jnp.ones((2 * c,), jnp.float32)])
    wqkv_s = (wqkv * scale_vec[None, :]).astype(jnp.bfloat16)     # (C, 3C)
    bqkv_s = (bqkv * scale_vec).reshape(1, 3 * c)                 # (1, 3C) f32
    return (wqkv_s, bqkv_s,
            wo.astype(jnp.bfloat16), bo.reshape(1, c),
            g1.reshape(1, c), be1.reshape(1, c),
            w1.astype(jnp.bfloat16), b1.reshape(1, -1),
            w2.astype(jnp.bfloat16), b2.reshape(1, c),
            g2.reshape(1, c), be2.reshape(1, c))


def reference(x, params):
    # Pure-JAX f32 reference matching the PyTorch module.
    # (Weights use the in-file (in, out) layout; importing real nn.MultiheadAttention
    #  weights would need a transpose in prepare_params.)
    (wqkv, bqkv, wo, bo, g1, be1, w1, b1, w2, b2, g2, be2) = params
    bsz, seq, c = x.shape
    nh, dk = NUM_HEADS, c // NUM_HEADS

    def ln(h, g, be):
        mu = jnp.mean(h, axis=-1, keepdims=True)
        var = jnp.mean((h - mu) ** 2, axis=-1, keepdims=True)
        return (h - mu) * jax.lax.rsqrt(var + LN_EPS) * g + be

    qkv = x @ wqkv + bqkv
    q, k, v = jnp.split(qkv, 3, axis=-1)

    def split_heads(tns):
        return tns.reshape(bsz, seq, nh, dk).transpose(0, 2, 1, 3)

    q, k, v = split_heads(q), split_heads(k), split_heads(v)
    s = jnp.einsum("bhqd,bhkd->bhqk", q, k) / math.sqrt(dk)
    w = jax.nn.softmax(s, axis=-1)
    a = jnp.einsum("bhqk,bhkd->bhqd", w, v).transpose(0, 2, 1, 3).reshape(bsz, seq, c)
    a = a @ wo + bo
    h1 = ln(x + a, g1, be1)
    f = jnp.maximum(h1 @ w1 + b1, 0.0) @ w2 + b2
    return ln(h1 + f, g2, be2)


if __name__ == "__main__":
    key = jax.random.PRNGKey(0)
    ks = jax.random.split(key, 10)

    x = jax.random.normal(ks[0], (B, T, D_MODEL), dtype=jnp.float32)

    # deterministic parameter init (PyTorch-like layout: W stored as (in, out))
    wqkv = jax.random.normal(ks[1], (D_MODEL, 3 * D_MODEL), jnp.float32) * 0.05
    bqkv = jax.random.normal(ks[2], (3 * D_MODEL,), jnp.float32) * 0.02
    wo = jax.random.normal(ks[3], (D_MODEL, D_MODEL), jnp.float32) * 0.05
    bo = jax.random.normal(ks[4], (D_MODEL,), jnp.float32) * 0.02
    g1 = jnp.ones((D_MODEL,), jnp.float32)
    be1 = jnp.zeros((D_MODEL,), jnp.float32)
    w1 = jax.random.normal(ks[5], (D_MODEL, D_FF), jnp.float32) * 0.05
    b1 = jax.random.normal(ks[6], (D_FF,), jnp.float32) * 0.02
    w2 = jax.random.normal(ks[7], (D_FF, D_MODEL), jnp.float32) * 0.05
    b2 = jax.random.normal(ks[8], (D_MODEL,), jnp.float32) * 0.02
    g2 = jnp.ones((D_MODEL,), jnp.float32)
    be2 = jnp.zeros((D_MODEL,), jnp.float32)

    params = (wqkv, bqkv, wo, bo, g1, be1, w1, b1, w2, b2, g2, be2)
    kparams = prepare_params(params)

    out = transformer_encoder_block(x, kparams)
    out = jax.block_until_ready(out)

    ref = reference(x, params)
    # bf16 matmul operands (f32 accumulation) + approx reciprocal -> relaxed tolerance.
    np.testing.assert_allclose(np.asarray(out), np.asarray(ref), rtol=2e-2, atol=2e-2)

    print("KERNEL_OK")
</pallas_src>

<mosaic_0001>
module attributes {stable_mosaic.version = 11 : i64} {
  func.func @encoder_block_kernel(%arg0: i32, %arg1: memref<2x8x128xf32, #tpu.memory_space<vmem>>, %arg2: memref<128x384xbf16, #tpu.memory_space<vmem>>, %arg3: memref<1x384xf32, #tpu.memory_space<vmem>>, %arg4: memref<128x128xbf16, #tpu.memory_space<vmem>>, %arg5: memref<1x128xf32, #tpu.memory_space<vmem>>, %arg6: memref<1x128xf32, #tpu.memory_space<vmem>>, %arg7: memref<1x128xf32, #tpu.memory_space<vmem>>, %arg8: memref<128x256xbf16, #tpu.memory_space<vmem>>, %arg9: memref<1x256xf32, #tpu.memory_space<vmem>>, %arg10: memref<256x128xbf16, #tpu.memory_space<vmem>>, %arg11: memref<1x128xf32, #tpu.memory_space<vmem>>, %arg12: memref<1x128xf32, #tpu.memory_space<vmem>>, %arg13: memref<1x128xf32, #tpu.memory_space<vmem>>, %arg14: memref<2x8x128xf32, #tpu.memory_space<vmem>>) attributes {dimension_semantics = [#tpu.dimension_semantics<arbitrary>], iteration_bounds = array<i64: 1>, scalar_prefetch = 0 : i64, scratch_operands = 0 : i64, tpu.core_type = #tpu.core_type<tc>, window_params = [{pipeline_mode = #tpu.pipeline_mode<synchronous>, transform_indices = @transform_0, window_bounds = array<i64: 2, 8, 128>}, {pipeline_mode = #tpu.pipeline_mode<synchronous>, transform_indices = @transform_1, window_bounds = array<i64: 128, 384>}, {pipeline_mode = #tpu.pipeline_mode<synchronous>, transform_indices = @transform_2, window_bounds = array<i64: 1, 384>}, {pipeline_mode = #tpu.pipeline_mode<synchronous>, transform_indices = @transform_3, window_bounds = array<i64: 128, 128>}, {pipeline_mode = #tpu.pipeline_mode<synchronous>, transform_indices = @transform_4, window_bounds = array<i64: 1, 128>}, {pipeline_mode = #tpu.pipeline_mode<synchronous>, transform_indices = @transform_5, window_bounds = array<i64: 1, 128>}, {pipeline_mode = #tpu.pipeline_mode<synchronous>, transform_indices = @transform_6, window_bounds = array<i64: 1, 128>}, {pipeline_mode = #tpu.pipeline_mode<synchronous>, transform_indices = @transform_7, window_bounds = array<i64: 128, 256>}, {pipeline_mode = #tpu.pipeline_mode<synchronous>, transform_indices = @transform_8, window_bounds = array<i64: 1, 256>}, {pipeline_mode = #tpu.pipeline_mode<synchronous>, transform_indices = @transform_9, window_bounds = array<i64: 256, 128>}, {pipeline_mode = #tpu.pipeline_mode<synchronous>, transform_indices = @transform_10, window_bounds = array<i64: 1, 128>}, {pipeline_mode = #tpu.pipeline_mode<synchronous>, transform_indices = @transform_11, window_bounds = array<i64: 1, 128>}, {pipeline_mode = #tpu.pipeline_mode<synchronous>, transform_indices = @transform_12, window_bounds = array<i64: 1, 128>}, {pipeline_mode = #tpu.pipeline_mode<synchronous>, transform_indices = @transform_13, window_bounds = array<i64: 2, 8, 128>}]} {
    %c0 = arith.constant 0 : index
    %c0_0 = arith.constant 0 : index
    %0 = vector.load %arg2[%c0, %c0_0] : memref<128x384xbf16, #tpu.memory_space<vmem>>, vector<128x384xbf16>
    %c0_1 = arith.constant 0 : index
    %c0_2 = arith.constant 0 : index
    %1 = vector.load %arg3[%c0_1, %c0_2] : memref<1x384xf32, #tpu.memory_space<vmem>>, vector<1x384xf32>
    %c0_3 = arith.constant 0 : index
    %c0_4 = arith.constant 0 : index
    %2 = vector.load %arg4[%c0_3, %c0_4] : memref<128x128xbf16, #tpu.memory_space<vmem>>, vector<128x128xbf16>
    %c0_5 = arith.constant 0 : index
    %c0_6 = arith.constant 0 : index
    %3 = vector.load %arg5[%c0_5, %c0_6] : memref<1x128xf32, #tpu.memory_space<vmem>>, vector<1x128xf32>
    %c0_7 = arith.constant 0 : index
    %c0_8 = arith.constant 0 : index
    %4 = vector.load %arg6[%c0_7, %c0_8] : memref<1x128xf32, #tpu.memory_space<vmem>>, vector<1x128xf32>
    %c0_9 = arith.constant 0 : index
    %c0_10 = arith.constant 0 : index
    %5 = vector.load %arg7[%c0_9, %c0_10] : memref<1x128xf32, #tpu.memory_space<vmem>>, vector<1x128xf32>
    %c0_11 = arith.constant 0 : index
    %c0_12 = arith.constant 0 : index
    %6 = vector.load %arg8[%c0_11, %c0_12] : memref<128x256xbf16, #tpu.memory_space<vmem>>, vector<128x256xbf16>
    %c0_13 = arith.constant 0 : index
    %c0_14 = arith.constant 0 : index
    %7 = vector.load %arg9[%c0_13, %c0_14] : memref<1x256xf32, #tpu.memory_space<vmem>>, vector<1x256xf32>
    %c0_15 = arith.constant 0 : index
    %c0_16 = arith.constant 0 : index
    %8 = vector.load %arg10[%c0_15, %c0_16] : memref<256x128xbf16, #tpu.memory_space<vmem>>, vector<256x128xbf16>
    %c0_17 = arith.constant 0 : index
    %c0_18 = arith.constant 0 : index
    %9 = vector.load %arg11[%c0_17, %c0_18] : memref<1x128xf32, #tpu.memory_space<vmem>>, vector<1x128xf32>
    %c0_19 = arith.constant 0 : index
    %c0_20 = arith.constant 0 : index
    %10 = vector.load %arg12[%c0_19, %c0_20] : memref<1x128xf32, #tpu.memory_space<vmem>>, vector<1x128xf32>
    %c0_21 = arith.constant 0 : index
    %c0_22 = arith.constant 0 : index
    %11 = vector.load %arg13[%c0_21, %c0_22] : memref<1x128xf32, #tpu.memory_space<vmem>>, vector<1x128xf32>
    %c0_23 = arith.constant 0 : index
    %c0_24 = arith.constant 0 : index
    %c0_25 = arith.constant 0 : index
    %12 = vector.load %arg1[%c0_23, %c0_24, %c0_25] : memref<2x8x128xf32, #tpu.memory_space<vmem>>, vector<2x8x128xf32>
    %13 = vector.shape_cast %12 : vector<2x8x128xf32> to vector<16x128xf32>
    %14 = arith.truncf %13 : vector<16x128xf32> to vector<16x128xbf16>
    %cst = arith.constant dense<0.000000e+00> : vector<16x384xf32>
    %15 = tpu.matmul %14, %0, %cst {dimension_numbers = #tpu.dot_dimension_numbers<[1], [0], [0], [1], [0, 0, 1, 1], [], []>} : vector<16x128xbf16>, vector<128x384xbf16>, vector<16x384xf32> -> vector<16x384xf32>
    %16 = vector.broadcast %1 : vector<1x384xf32> to vector<16x384xf32>
    %17 = arith.addf %15, %16 : vector<16x384xf32>
    %18 = vector.extract_strided_slice %17 {offsets = [0, 0], sizes = [16, 128], strides = [1, 1]} : vector<16x384xf32> to vector<16x128xf32>
    %19 = vector.extract_strided_slice %17 {offsets = [0, 128], sizes = [16, 128], strides = [1, 1]} : vector<16x384xf32> to vector<16x128xf32>
    %20 = vector.extract_strided_slice %17 {offsets = [0, 256], sizes = [16, 128], strides = [1, 1]} : vector<16x384xf32> to vector<16x128xf32>
    %21 = vector.extract_strided_slice %18 {offsets = [0, 0], sizes = [8, 128], strides = [1, 1]} : vector<16x128xf32> to vector<8x128xf32>
    %22 = vector.extract_strided_slice %21 {offsets = [0, 0], sizes = [8, 16], strides = [1, 1]} : vector<8x128xf32> to vector<8x16xf32>
    %23 = vector.extract_strided_slice %21 {offsets = [0, 16], sizes = [8, 16], strides = [1, 1]} : vector<8x128xf32> to vector<8x16xf32>
    %24 = vector.extract_strided_slice %21 {offsets = [0, 32], sizes = [8, 16], strides = [1, 1]} : vector<8x128xf32> to vector<8x16xf32>
    %25 = vector.extract_strided_slice %21 {offsets = [0, 48], sizes = [8, 16], strides = [1, 1]} : vector<8x128xf32> to vector<8x16xf32>
    %26 = vector.extract_strided_slice %21 {offsets = [0, 64], sizes = [8, 16], strides = [1, 1]} : vector<8x128xf32> to vector<8x16xf32>
    %27 = vector.extract_strided_slice %21 {offsets = [0, 80], sizes = [8, 16], strides = [1, 1]} : vector<8x128xf32> to vector<8x16xf32>
    %28 = vector.extract_strided_slice %21 {offsets = [0, 96], sizes = [8, 16], strides = [1, 1]} : vector<8x128xf32> to vector<8x16xf32>
    %29 = vector.extract_strided_slice %21 {offsets = [0, 112], sizes = [8, 16], strides = [1, 1]} : vector<8x128xf32> to vector<8x16xf32>
    %30 = vector.extract_strided_slice %18 {offsets = [8, 0], sizes = [8, 128], strides = [1, 1]} : vector<16x128xf32> to vector<8x128xf32>
    %31 = vector.extract_strided_slice %30 {offsets = [0, 0], sizes = [8, 16], strides = [1, 1]} : vector<8x128xf32> to vector<8x16xf32>
    %32 = vector.extract_strided_slice %30 {offsets = [0, 16], sizes = [8, 16], strides = [1, 1]} : vector<8x128xf32> to vector<8x16xf32>
    %33 = vector.extract_strided_slice %30 {offsets = [0, 32], sizes = [8, 16], strides = [1, 1]} : vector<8x128xf32> to vector<8x16xf32>
    %34 = vector.extract_strided_slice %30 {offsets = [0, 48], sizes = [8, 16], strides = [1, 1]} : vector<8x128xf32> to vector<8x16xf32>
    %35 = vector.extract_strided_slice %30 {offsets = [0, 64], sizes = [8, 16], strides = [1, 1]} : vector<8x128xf32> to vector<8x16xf32>
    %36 = vector.extract_strided_slice %30 {offsets = [0, 80], sizes = [8, 16], strides = [1, 1]} : vector<8x128xf32> to vector<8x16xf32>
    %37 = vector.extract_strided_slice %30 {offsets = [0, 96], sizes = [8, 16], strides = [1, 1]} : vector<8x128xf32> to vector<8x16xf32>
    %38 = vector.extract_strided_slice %30 {offsets = [0, 112], sizes = [8, 16], strides = [1, 1]} : vector<8x128xf32> to vector<8x16xf32>
    %39 = vector.shape_cast %22 : vector<8x16xf32> to vector<1x8x16xf32>
    %40 = vector.shape_cast %23 : vector<8x16xf32> to vector<1x8x16xf32>
    %41 = vector.shape_cast %24 : vector<8x16xf32> to vector<1x8x16xf32>
    %42 = vector.shape_cast %25 : vector<8x16xf32> to vector<1x8x16xf32>
    %43 = vector.shape_cast %26 : vector<8x16xf32> to vector<1x8x16xf32>
    %44 = vector.shape_cast %27 : vector<8x16xf32> to vector<1x8x16xf32>
    %45 = vector.shape_cast %28 : vector<8x16xf32> to vector<1x8x16xf32>
    %46 = vector.shape_cast %29 : vector<8x16xf32> to vector<1x8x16xf32>
    %47 = vector.shape_cast %31 : vector<8x16xf32> to vector<1x8x16xf32>
    %48 = vector.shape_cast %32 : vector<8x16xf32> to vector<1x8x16xf32>
    %49 = vector.shape_cast %33 : vector<8x16xf32> to vector<1x8x16xf32>
    %50 = vector.shape_cast %34 : vector<8x16xf32> to vector<1x8x16xf32>
    %51 = vector.shape_cast %35 : vector<8x16xf32> to vector<1x8x16xf32>
    %52 = vector.shape_cast %36 : vector<8x16xf32> to vector<1x8x16xf32>
    %53 = vector.shape_cast %37 : vector<8x16xf32> to vector<1x8x16xf32>
    %54 = vector.shape_cast %38 : vector<8x16xf32> to vector<1x8x16xf32>
    %55 = tpu.concatenate %39, %40, %41, %42, %43, %44, %45, %46, %47, %48, %49, %50, %51, %52, %53, %54 in 0 : vector<1x8x16xf32>, vector<1x8x16xf32>, vector<1x8x16xf32>, vector<1x8x16xf32>, vector<1x8x16xf32>, vector<1x8x16xf32>, vector<1x8x16xf32>, vector<1x8x16xf32>, vector<1x8x16xf32>, vector<1x8x16xf32>, vector<1x8x16xf32>, vector<1x8x16xf32>, vector<1x8x16xf32>, vector<1x8x16xf32>, vector<1x8x16xf32>, vector<1x8x16xf32> -> vector<16x8x16xf32>
    %56 = arith.truncf %55 : vector<16x8x16xf32> to vector<16x8x16xbf16>
    %57 = vector.extract_strided_slice %19 {offsets = [0, 0], sizes = [8, 128], strides = [1, 1]} : vector<16x128xf32> to vector<8x128xf32>
    %58 = vector.extract_strided_slice %57 {offsets = [0, 0], sizes = [8, 16], strides = [1, 1]} : vector<8x128xf32> to vector<8x16xf32>
    %59 = vector.extract_strided_slice %57 {offsets = [0, 16], sizes = [8, 16], strides = [1, 1]} : vector<8x128xf32> to vector<8x16xf32>
    %60 = vector.extract_strided_slice %57 {offsets = [0, 32], sizes = [8, 16], strides = [1, 1]} : vector<8x128xf32> to vector<8x16xf32>
    %61 = vector.extract_strided_slice %57 {offsets = [0, 48], sizes = [8, 16], strides = [1, 1]} : vector<8x128xf32> to vector<8x16xf32>
    %62 = vector.extract_strided_slice %57 {offsets = [0, 64], sizes = [8, 16], strides = [1, 1]} : vector<8x128xf32> to vector<8x16xf32>
    %63 = vector.extract_strided_slice %57 {offsets = [0, 80], sizes = [8, 16], strides = [1, 1]} : vector<8x128xf32> to vector<8x16xf32>
    %64 = vector.extract_strided_slice %57 {offsets = [0, 96], sizes = [8, 16], strides = [1, 1]} : vector<8x128xf32> to vector<8x16xf32>
    %65 = vector.extract_strided_slice %57 {offsets = [0, 112], sizes = [8, 16], strides = [1, 1]} : vector<8x128xf32> to vector<8x16xf32>
    %66 = vector.extract_strided_slice %19 {offsets = [8, 0], sizes = [8, 128], strides = [1, 1]} : vector<16x128xf32> to vector<8x128xf32>
    %67 = vector.extract_strided_slice %66 {offsets = [0, 0], sizes = [8, 16], strides = [1, 1]} : vector<8x128xf32> to vector<8x16xf32>
    %68 = vector.extract_strided_slice %66 {offsets = [0, 16], sizes = [8, 16], strides = [1, 1]} : vector<8x128xf32> to vector<8x16xf32>
    %69 = vector.extract_strided_slice %66 {offsets = [0, 32], sizes = [8, 16], strides = [1, 1]} : vector<8x128xf32> to vector<8x16xf32>
    %70 = vector.extract_strided_slice %66 {offsets = [0, 48], sizes = [8, 16], strides = [1, 1]} : vector<8x128xf32> to vector<8x16xf32>
    %71 = vector.extract_strided_slice %66 {offsets = [0, 64], sizes = [8, 16], strides = [1, 1]} : vector<8x128xf32> to vector<8x16xf32>
    %72 = vector.extract_strided_slice %66 {offsets = [0, 80], sizes = [8, 16], strides = [1, 1]} : vector<8x128xf32> to vector<8x16xf32>
    %73 = vector.extract_strided_slice %66 {offsets = [0, 96], sizes = [8, 16], strides = [1, 1]} : vector<8x128xf32> to vector<8x16xf32>
    %74 = vector.extract_strided_slice %66 {offsets = [0, 112], sizes = [8, 16], strides = [1, 1]} : vector<8x128xf32> to vector<8x16xf32>
    %75 = vector.shape_cast %58 : vector<8x16xf32> to vector<1x8x16xf32>
    %76 = vector.shape_cast %59 : vector<8x16xf32> to vector<1x8x16xf32>
    %77 = vector.shape_cast %60 : vector<8x16xf32> to vector<1x8x16xf32>
    %78 = vector.shape_cast %61 : vector<8x16xf32> to vector<1x8x16xf32>
    %79 = vector.shape_cast %62 : vector<8x16xf32> to vector<1x8x16xf32>
    %80 = vector.shape_cast %63 : vector<8x16xf32> to vector<1x8x16xf32>
    %81 = vector.shape_cast %64 : vector<8x16xf32> to vector<1x8x16xf32>
    %82 = vector.shape_cast %65 : vector<8x16xf32> to vector<1x8x16xf32>
    %83 = vector.shape_cast %67 : vector<8x16xf32> to vector<1x8x16xf32>
    %84 = vector.shape_cast %68 : vector<8x16xf32> to vector<1x8x16xf32>
    %85 = vector.shape_cast %69 : vector<8x16xf32> to vector<1x8x16xf32>
    %86 = vector.shape_cast %70 : vector<8x16xf32> to vector<1x8x16xf32>
    %87 = vector.shape_cast %71 : vector<8x16xf32> to vector<1x8x16xf32>
    %88 = vector.shape_cast %72 : vector<8x16xf32> to vector<1x8x16xf32>
    %89 = vector.shape_cast %73 : vector<8x16xf32> to vector<1x8x16xf32>
    %90 = vector.shape_cast %74 : vector<8x16xf32> to vector<1x8x16xf32>
    %91 = tpu.concatenate %75, %76, %77, %78, %79, %80, %81, %82, %83, %84, %85, %86, %87, %88, %89, %90 in 0 : vector<1x8x16xf32>, vector<1x8x16xf32>, vector<1x8x16xf32>, vector<1x8x16xf32>, vector<1x8x16xf32>, vector<1x8x16xf32>, vector<1x8x16xf32>, vector<1x8x16xf32>, vector<1x8x16xf32>, vector<1x8x16xf32>, vector<1x8x16xf32>, vector<1x8x16xf32>, vector<1x8x16xf32>, vector<1x8x16xf32>, vector<1x8x16xf32>, vector<1x8x16xf32> -> vector<16x8x16xf32>
    %92 = arith.truncf %91 : vector<16x8x16xf32> to vector<16x8x16xbf16>
    %93 = vector.extract_strided_slice %20 {offsets = [0, 0], sizes = [8, 128], strides = [1, 1]} : vector<16x128xf32> to vector<8x128xf32>
    %94 = vector.extract_strided_slice %93 {offsets = [0, 0], sizes = [8, 16], strides = [1, 1]} : vector<8x128xf32> to vector<8x16xf32>
    %95 = vector.extract_strided_slice %93 {offsets = [0, 16], sizes = [8, 16], strides = [1, 1]} : vector<8x128xf32> to vector<8x16xf32>
    %96 = vector.extract_strided_slice %93 {offsets = [0, 32], sizes = [8, 16], strides = [1, 1]} : vector<8x128xf32> to vector<8x16xf32>
    %97 = vector.extract_strided_slice %93 {offsets = [0, 48], sizes = [8, 16], strides = [1, 1]} : vector<8x128xf32> to vector<8x16xf32>
    %98 = vector.extract_strided_slice %93 {offsets = [0, 64], sizes = [8, 16], strides = [1, 1]} : vector<8x128xf32> to vector<8x16xf32>
    %99 = vector.extract_strided_slice %93 {offsets = [0, 80], sizes = [8, 16], strides = [1, 1]} : vector<8x128xf32> to vector<8x16xf32>
    %100 = vector.extract_strided_slice %93 {offsets = [0, 96], sizes = [8, 16], strides = [1, 1]} : vector<8x128xf32> to vector<8x16xf32>
    %101 = vector.extract_strided_slice %93 {offsets = [0, 112], sizes = [8, 16], strides = [1, 1]} : vector<8x128xf32> to vector<8x16xf32>
    %102 = vector.extract_strided_slice %20 {offsets = [8, 0], sizes = [8, 128], strides = [1, 1]} : vector<16x128xf32> to vector<8x128xf32>
    %103 = vector.extract_strided_slice %102 {offsets = [0, 0], sizes = [8, 16], strides = [1, 1]} : vector<8x128xf32> to vector<8x16xf32>
    %104 = vector.extract_strided_slice %102 {offsets = [0, 16], sizes = [8, 16], strides = [1, 1]} : vector<8x128xf32> to vector<8x16xf32>
    %105 = vector.extract_strided_slice %102 {offsets = [0, 32], sizes = [8, 16], strides = [1, 1]} : vector<8x128xf32> to vector<8x16xf32>
    %106 = vector.extract_strided_slice %102 {offsets = [0, 48], sizes = [8, 16], strides = [1, 1]} : vector<8x128xf32> to vector<8x16xf32>
    %107 = vector.extract_strided_slice %102 {offsets = [0, 64], sizes = [8, 16], strides = [1, 1]} : vector<8x128xf32> to vector<8x16xf32>
    %108 = vector.extract_strided_slice %102 {offsets = [0, 80], sizes = [8, 16], strides = [1, 1]} : vector<8x128xf32> to vector<8x16xf32>
    %109 = vector.extract_strided_slice %102 {offsets = [0, 96], sizes = [8, 16], strides = [1, 1]} : vector<8x128xf32> to vector<8x16xf32>
    %110 = vector.extract_strided_slice %102 {offsets = [0, 112], sizes = [8, 16], strides = [1, 1]} : vector<8x128xf32> to vector<8x16xf32>
    %111 = vector.shape_cast %94 : vector<8x16xf32> to vector<1x8x16xf32>
    %112 = vector.shape_cast %95 : vector<8x16xf32> to vector<1x8x16xf32>
    %113 = vector.shape_cast %96 : vector<8x16xf32> to vector<1x8x16xf32>
    %114 = vector.shape_cast %97 : vector<8x16xf32> to vector<1x8x16xf32>
    %115 = vector.shape_cast %98 : vector<8x16xf32> to vector<1x8x16xf32>
    %116 = vector.shape_cast %99 : vector<8x16xf32> to vector<1x8x16xf32>
    %117 = vector.shape_cast %100 : vector<8x16xf32> to vector<1x8x16xf32>
    %118 = vector.shape_cast %101 : vector<8x16xf32> to vector<1x8x16xf32>
    %119 = vector.shape_cast %103 : vector<8x16xf32> to vector<1x8x16xf32>
    %120 = vector.shape_cast %104 : vector<8x16xf32> to vector<1x8x16xf32>
    %121 = vector.shape_cast %105 : vector<8x16xf32> to vector<1x8x16xf32>
    %122 = vector.shape_cast %106 : vector<8x16xf32> to vector<1x8x16xf32>
    %123 = vector.shape_cast %107 : vector<8x16xf32> to vector<1x8x16xf32>
    %124 = vector.shape_cast %108 : vector<8x16xf32> to vector<1x8x16xf32>
    %125 = vector.shape_cast %109 : vector<8x16xf32> to vector<1x8x16xf32>
    %126 = vector.shape_cast %110 : vector<8x16xf32> to vector<1x8x16xf32>
    %127 = tpu.concatenate %111, %112, %113, %114, %115, %116, %117, %118, %119, %120, %121, %122, %123, %124, %125, %126 in 0 : vector<1x8x16xf32>, vector<1x8x16xf32>, vector<1x8x16xf32>, vector<1x8x16xf32>, vector<1x8x16xf32>, vector<1x8x16xf32>, vector<1x8x16xf32>, vector<1x8x16xf32>, vector<1x8x16xf32>, vector<1x8x16xf32>, vector<1x8x16xf32>, vector<1x8x16xf32>, vector<1x8x16xf32>, vector<1x8x16xf32>, vector<1x8x16xf32>, vector<1x8x16xf32> -> vector<16x8x16xf32>
    %128 = arith.truncf %127 : vector<16x8x16xf32> to vector<16x8x16xbf16>
    %cst_26 = arith.constant dense<0.000000e+00> : vector<16x8x8xf32>
    %129 = tpu.matmul %56, %92, %cst_26 {dimension_numbers = #tpu.dot_dimension_numbers<[2], [2], [1], [1], [0, 0, 0, 1, 1, 1], [0], [0]>} : vector<16x8x16xbf16>, vector<16x8x16xbf16>, vector<16x8x8xf32> -> vector<16x8x8xf32>
    %cst_27 = arith.constant dense<0xFF800000> : vector<16x8xf32>
    %130 = vector.multi_reduction <maximumf>, %129, %cst_27 [2] : vector<16x8x8xf32> to vector<16x8xf32>
    %131 = vector.shape_cast %130 : vector<16x8xf32> to vector<16x8x1xf32>
    %132 = vector.broadcast %131 : vector<16x8x1xf32> to vector<16x8x8xf32>
    %133 = arith.subf %129, %132 : vector<16x8x8xf32>
    %134 = math.exp %133 : vector<16x8x8xf32>
    %cst_28 = arith.constant dense<0.000000e+00> : vector<16x8xf32>
    %135 = vector.multi_reduction <add>, %134, %cst_28 [2] : vector<16x8x8xf32> to vector<16x8xf32>
    %136 = vector.shape_cast %135 : vector<16x8xf32> to vector<16x8x1xf32>
    %137 = tpu.reciprocal %136 {approx = true} : vector<16x8x1xf32> -> vector<16x8x1xf32>
    %138 = vector.broadcast %137 : vector<16x8x1xf32> to vector<16x8x8xf32>
    %139 = arith.mulf %134, %138 : vector<16x8x8xf32>
    %140 = arith.truncf %139 : vector<16x8x8xf32> to vector<16x8x8xbf16>
    %cst_29 = arith.constant dense<0.000000e+00> : vector<16x8x16xf32>
    %141 = tpu.matmul %140, %128, %cst_29 {dimension_numbers = #tpu.dot_dimension_numbers<[2], [1], [1], [2], [0, 0, 0, 1, 1, 2], [0], [0]>} : vector<16x8x8xbf16>, vector<16x8x16xbf16>, vector<16x8x16xf32> -> vector<16x8x16xf32>
    %142 = vector.extract_strided_slice %141 {offsets = [0, 0, 0], sizes = [1, 8, 16], strides = [1, 1, 1]} : vector<16x8x16xf32> to vector<1x8x16xf32>
    %143 = vector.shape_cast %142 : vector<1x8x16xf32> to vector<8x16xf32>
    %144 = vector.extract_strided_slice %141 {offsets = [1, 0, 0], sizes = [1, 8, 16], strides = [1, 1, 1]} : vector<16x8x16xf32> to vector<1x8x16xf32>
    %145 = vector.shape_cast %144 : vector<1x8x16xf32> to vector<8x16xf32>
    %146 = vector.extract_strided_slice %141 {offsets = [2, 0, 0], sizes = [1, 8, 16], strides = [1, 1, 1]} : vector<16x8x16xf32> to vector<1x8x16xf32>
    %147 = vector.shape_cast %146 : vector<1x8x16xf32> to vector<8x16xf32>
    %148 = vector.extract_strided_slice %141 {offsets = [3, 0, 0], sizes = [1, 8, 16], strides = [1, 1, 1]} : vector<16x8x16xf32> to vector<1x8x16xf32>
    %149 = vector.shape_cast %148 : vector<1x8x16xf32> to vector<8x16xf32>
    %150 = vector.extract_strided_slice %141 {offsets = [4, 0, 0], sizes = [1, 8, 16], strides = [1, 1, 1]} : vector<16x8x16xf32> to vector<1x8x16xf32>
    %151 = vector.shape_cast %150 : vector<1x8x16xf32> to vector<8x16xf32>
    %152 = vector.extract_strided_slice %141 {offsets = [5, 0, 0], sizes = [1, 8, 16], strides = [1, 1, 1]} : vector<16x8x16xf32> to vector<1x8x16xf32>
    %153 = vector.shape_cast %152 : vector<1x8x16xf32> to vector<8x16xf32>
    %154 = vector.extract_strided_slice %141 {offsets = [6, 0, 0], sizes = [1, 8, 16], strides = [1, 1, 1]} : vector<16x8x16xf32> to vector<1x8x16xf32>
    %155 = vector.shape_cast %154 : vector<1x8x16xf32> to vector<8x16xf32>
    %156 = vector.extract_strided_slice %141 {offsets = [7, 0, 0], sizes = [1, 8, 16], strides = [1, 1, 1]} : vector<16x8x16xf32> to vector<1x8x16xf32>
    %157 = vector.shape_cast %156 : vector<1x8x16xf32> to vector<8x16xf32>
    %158 = tpu.concatenate %143, %145, %147, %149, %151, %153, %155, %157 in 1 : vector<8x16xf32>, vector<8x16xf32>, vector<8x16xf32>, vector<8x16xf32>, vector<8x16xf32>, vector<8x16xf32>, vector<8x16xf32>, vector<8x16xf32> -> vector<8x128xf32>
    %159 = vector.extract_strided_slice %141 {offsets = [8, 0, 0], sizes = [1, 8, 16], strides = [1, 1, 1]} : vector<16x8x16xf32> to vector<1x8x16xf32>
    %160 = vector.shape_cast %159 : vector<1x8x16xf32> to vector<8x16xf32>
    %161 = vector.extract_strided_slice %141 {offsets = [9, 0, 0], sizes = [1, 8, 16], strides = [1, 1, 1]} : vector<16x8x16xf32> to vector<1x8x16xf32>
    %162 = vector.shape_cast %161 : vector<1x8x16xf32> to vector<8x16xf32>
    %163 = vector.extract_strided_slice %141 {offsets = [10, 0, 0], sizes = [1, 8, 16], strides = [1, 1, 1]} : vector<16x8x16xf32> to vector<1x8x16xf32>
    %164 = vector.shape_cast %163 : vector<1x8x16xf32> to vector<8x16xf32>
    %165 = vector.extract_strided_slice %141 {offsets = [11, 0, 0], sizes = [1, 8, 16], strides = [1, 1, 1]} : vector<16x8x16xf32> to vector<1x8x16xf32>
    %166 = vector.shape_cast %165 : vector<1x8x16xf32> to vector<8x16xf32>
    %167 = vector.extract_strided_slice %141 {offsets = [12, 0, 0], sizes = [1, 8, 16], strides = [1, 1, 1]} : vector<16x8x16xf32> to vector<1x8x16xf32>
    %168 = vector.shape_cast %167 : vector<1x8x16xf32> to vector<8x16xf32>
    %169 = vector.extract_strided_slice %141 {offsets = [13, 0, 0], sizes = [1, 8, 16], strides = [1, 1, 1]} : vector<16x8x16xf32> to vector<1x8x16xf32>
    %170 = vector.shape_cast %169 : vector<1x8x16xf32> to vector<8x16xf32>
    %171 = vector.extract_strided_slice %141 {offsets = [14, 0, 0], sizes = [1, 8, 16], strides = [1, 1, 1]} : vector<16x8x16xf32> to vector<1x8x16xf32>
    %172 = vector.shape_cast %171 : vector<1x8x16xf32> to vector<8x16xf32>
    %173 = vector.extract_strided_slice %141 {offsets = [15, 0, 0], sizes = [1, 8, 16], strides = [1, 1, 1]} : vector<16x8x16xf32> to vector<1x8x16xf32>
    %174 = vector.shape_cast %173 : vector<1x8x16xf32> to vector<8x16xf32>
    %175 = tpu.concatenate %160, %162, %164, %166, %168, %170, %172, %174 in 1 : vector<8x16xf32>, vector<8x16xf32>, vector<8x16xf32>, vector<8x16xf32>, vector<8x16xf32>, vector<8x16xf32>, vector<8x16xf32>, vector<8x16xf32> -> vector<8x128xf32>
    %176 = tpu.concatenate %158, %175 in 0 : vector<8x128xf32>, vector<8x128xf32> -> vector<16x128xf32>
    %177 = arith.truncf %176 : vector<16x128xf32> to vector<16x128xbf16>
    %cst_30 = arith.constant dense<0.000000e+00> : vector<16x128xf32>
    %178 = tpu.matmul %177, %2, %cst_30 {dimension_numbers = #tpu.dot_dimension_numbers<[1], [0], [0], [1], [0, 0, 1, 1], [], []>} : vector<16x128xbf16>, vector<128x128xbf16>, vector<16x128xf32> -> vector<16x128xf32>
    %179 = vector.broadcast %3 : vector<1x128xf32> to vector<16x128xf32>
    %180 = arith.addf %178, %179 : vector<16x128xf32>
    %181 = arith.addf %13, %180 : vector<16x128xf32>
    %cst_31 = arith.constant dense<0.000000e+00> : vector<16xf32>
    %182 = vector.multi_reduction <add>, %181, %cst_31 [1] : vector<16x128xf32> to vector<16xf32>
    %183 = vector.shape_cast %182 : vector<16xf32> to vector<16x1xf32>
    %cst_32 = arith.constant 1.280000e+02 : f32
    %184 = vector.broadcast %cst_32 : f32 to vector<16x1xf32>
    %185 = arith.divf %183, %184 : vector<16x1xf32>
    %186 = vector.broadcast %185 : vector<16x1xf32> to vector<16x128xf32>
    %187 = arith.subf %181, %186 : vector<16x128xf32>
    %188 = arith.mulf %187, %187 : vector<16x128xf32>
    %cst_33 = arith.constant dense<0.000000e+00> : vector<16xf32>
    %189 = vector.multi_reduction <add>, %188, %cst_33 [1] : vector<16x128xf32> to vector<16xf32>
    %190 = vector.shape_cast %189 : vector<16xf32> to vector<16x1xf32>
    %cst_34 = arith.constant 1.280000e+02 : f32
    %191 = vector.broadcast %cst_34 : f32 to vector<16x1xf32>
    %192 = arith.divf %190, %191 : vector<16x1xf32>
    %cst_35 = arith.constant 9.99999974E-6 : f32
    %193 = vector.broadcast %cst_35 : f32 to vector<16x1xf32>
    %194 = arith.addf %192, %193 : vector<16x1xf32>
    %195 = math.rsqrt %194 : vector<16x1xf32>
    %196 = vector.broadcast %195 : vector<16x1xf32> to vector<16x128xf32>
    %197 = arith.mulf %187, %196 : vector<16x128xf32>
    %198 = vector.broadcast %4 : vector<1x128xf32> to vector<16x128xf32>
    %199 = arith.mulf %197, %198 : vector<16x128xf32>
    %200 = vector.broadcast %5 : vector<1x128xf32> to vector<16x128xf32>
    %201 = arith.addf %199, %200 : vector<16x128xf32>
    %202 = arith.truncf %201 : vector<16x128xf32> to vector<16x128xbf16>
    %cst_36 = arith.constant dense<0.000000e+00> : vector<16x256xf32>
    %203 = tpu.matmul %202, %6, %cst_36 {dimension_numbers = #tpu.dot_dimension_numbers<[1], [0], [0], [1], [0, 0, 1, 1], [], []>} : vector<16x128xbf16>, vector<128x256xbf16>, vector<16x256xf32> -> vector<16x256xf32>
    %204 = vector.broadcast %7 : vector<1x256xf32> to vector<16x256xf32>
    %205 = arith.addf %203, %204 : vector<16x256xf32>
    %cst_37 = arith.constant 0.000000e+00 : f32
    %206 = vector.broadcast %cst_37 : f32 to vector<16x256xf32>
    %207 = arith.maximumf %205, %206 : vector<16x256xf32>
    %208 = arith.truncf %207 : vector<16x256xf32> to vector<16x256xbf16>
    %cst_38 = arith.constant dense<0.000000e+00> : vector<16x128xf32>
    %209 = tpu.matmul %208, %8, %cst_38 {dimension_numbers = #tpu.dot_dimension_numbers<[1], [0], [0], [1], [0, 0, 1, 1], [], []>} : vector<16x256xbf16>, vector<256x128xbf16>, vector<16x128xf32> -> vector<16x128xf32>
    %210 = vector.broadcast %9 : vector<1x128xf32> to vector<16x128xf32>
    %211 = arith.addf %209, %210 : vector<16x128xf32>
    %212 = arith.addf %201, %211 : vector<16x128xf32>
    %cst_39 = arith.constant dense<0.000000e+00> : vector<16xf32>
    %213 = vector.multi_reduction <add>, %212, %cst_39 [1] : vector<16x128xf32> to vector<16xf32>
    %214 = vector.shape_cast %213 : vector<16xf32> to vector<16x1xf32>
    %cst_40 = arith.constant 1.280000e+02 : f32
    %215 = vector.broadcast %cst_40 : f32 to vector<16x1xf32>
    %216 = arith.divf %214, %215 : vector<16x1xf32>
    %217 = vector.broadcast %216 : vector<16x1xf32> to vector<16x128xf32>
    %218 = arith.subf %212, %217 : vector<16x128xf32>
    %219 = arith.mulf %218, %218 : vector<16x128xf32>
    %cst_41 = arith.constant dense<0.000000e+00> : vector<16xf32>
    %220 = vector.multi_reduction <add>, %219, %cst_41 [1] : vector<16x128xf32> to vector<16xf32>
    %221 = vector.shape_cast %220 : vector<16xf32> to vector<16x1xf32>
    %cst_42 = arith.constant 1.280000e+02 : f32
    %222 = vector.broadcast %cst_42 : f32 to vector<16x1xf32>
    %223 = arith.divf %221, %222 : vector<16x1xf32>
    %cst_43 = arith.constant 9.99999974E-6 : f32
    %224 = vector.broadcast %cst_43 : f32 to vector<16x1xf32>
    %225 = arith.addf %223, %224 : vector<16x1xf32>
    %226 = math.rsqrt %225 : vector<16x1xf32>
    %227 = vector.broadcast %226 : vector<16x1xf32> to vector<16x128xf32>
    %228 = arith.mulf %218, %227 : vector<16x128xf32>
    %229 = vector.broadcast %10 : vector<1x128xf32> to vector<16x128xf32>
    %230 = arith.mulf %228, %229 : vector<16x128xf32>
    %231 = vector.broadcast %11 : vector<1x128xf32> to vector<16x128xf32>
    %232 = arith.addf %230, %231 : vector<16x128xf32>
    %233 = vector.shape_cast %232 : vector<16x128xf32> to vector<2x8x128xf32>
    %c0_44 = arith.constant 0 : index
    %c0_45 = arith.constant 0 : index
    %c0_46 = arith.constant 0 : index
    %234 = vector.load %arg14[%c0_44, %c0_45, %c0_46] : memref<2x8x128xf32, #tpu.memory_space<vmem>>, vector<2x8x128xf32>
    tpu.vector_store %arg14[%c0_44, %c0_45, %c0_46], %233 {strides = array<i32>} : memref<2x8x128xf32, #tpu.memory_space<vmem>>, vector<2x8x128xf32>,
    return
  }
  func.func @transform_0(%arg0: i32) -> (i32, i32, i32) {
    %c0_i32 = arith.constant 0 : i32
    %c0_i32_0 = arith.constant 0 : i32
    %c0_i32_1 = arith.constant 0 : i32
    %c0_i32_2 = arith.constant 0 : i32
    return %c0_i32, %c0_i32_0, %c0_i32_1 : i32, i32, i32
  }
  func.func @transform_1(%arg0: i32) -> (i32, i32) {
    %c0_i32 = arith.constant 0 : i32
    %c0_i32_0 = arith.constant 0 : i32
    %c0_i32_1 = arith.constant 0 : i32
    return %c0_i32, %c0_i32_0 : i32, i32
  }
  func.func @transform_2(%arg0: i32) -> (i32, i32) {
    %c0_i32 = arith.constant 0 : i32
    %c0_i32_0 = arith.constant 0 : i32
    %c0_i32_1 = arith.constant 0 : i32
    return %c0_i32, %c0_i32_0 : i32, i32
  }
  func.func @transform_3(%arg0: i32) -> (i32, i32) {
    %c0_i32 = arith.constant 0 : i32
    %c0_i32_0 = arith.constant 0 : i32
    %c0_i32_1 = arith.constant 0 : i32
    return %c0_i32, %c0_i32_0 : i32, i32
  }
  func.func @transform_4(%arg0: i32) -> (i32, i32) {
    %c0_i32 = arith.constant 0 : i32
    %c0_i32_0 = arith.constant 0 : i32
    %c0_i32_1 = arith.constant 0 : i32
    return %c0_i32, %c0_i32_0 : i32, i32
  }
  func.func @transform_5(%arg0: i32) -> (i32, i32) {
    %c0_i32 = arith.constant 0 : i32
    %c0_i32_0 = arith.constant 0 : i32
    %c0_i32_1 = arith.constant 0 : i32
    return %c0_i32, %c0_i32_0 : i32, i32
  }
  func.func @transform_6(%arg0: i32) -> (i32, i32) {
    %c0_i32 = arith.constant 0 : i32
    %c0_i32_0 = arith.constant 0 : i32
    %c0_i32_1 = arith.constant 0 : i32
    return %c0_i32, %c0_i32_0 : i32, i32
  }
  func.func @transform_7(%arg0: i32) -> (i32, i32) {
    %c0_i32 = arith.constant 0 : i32
    %c0_i32_0 = arith.constant 0 : i32
    %c0_i32_1 = arith.constant 0 : i32
    return %c0_i32, %c0_i32_0 : i32, i32
  }
  func.func @transform_8(%arg0: i32) -> (i32, i32) {
    %c0_i32 = arith.constant 0 : i32
    %c0_i32_0 = arith.constant 0 : i32
    %c0_i32_1 = arith.constant 0 : i32
    return %c0_i32, %c0_i32_0 : i32, i32
  }
  func.func @transform_9(%arg0: i32) -> (i32, i32) {
    %c0_i32 = arith.constant 0 : i32
    %c0_i32_0 = arith.constant 0 : i32
    %c0_i32_1 = arith.constant 0 : i32
    return %c0_i32, %c0_i32_0 : i32, i32
  }
  func.func @transform_10(%arg0: i32) -> (i32, i32) {
    %c0_i32 = arith.constant 0 : i32
    %c0_i32_0 = arith.constant 0 : i32
    %c0_i32_1 = arith.constant 0 : i32
    return %c0_i32, %c0_i32_0 : i32, i32
  }
  func.func @transform_11(%arg0: i32) -> (i32, i32) {
    %c0_i32 = arith.constant 0 : i32
    %c0_i32_0 = arith.constant 0 : i32
    %c0_i32_1 = arith.constant 0 : i32
    return %c0_i32, %c0_i32_0 : i32, i32
  }
  func.func @transform_12(%arg0: i32) -> (i32, i32) {
    %c0_i32 = arith.constant 0 : i32
    %c0_i32_0 = arith.constant 0 : i32
    %c0_i32_1 = arith.constant 0 : i32
    return %c0_i32, %c0_i32_0 : i32, i32
  }
  func.func @transform_13(%arg0: i32) -> (i32, i32, i32) {
    %c0_i32 = arith.constant 0 : i32
    %c0_i32_0 = arith.constant 0 : i32
    %c0_i32_1 = arith.constant 0 : i32
    %c0_i32_2 = arith.constant 0 : i32
    return %c0_i32, %c0_i32_0, %c0_i32_1 : i32, i32, i32
  }
}

</mosaic_0001>

<bundles_post_ra>
// kernel: transformer_encoder_block.1
= control target key start
LH: loop header
LB: loop body
LE: loop exit
PB: predicated region body
PF: predicated region fallthrough
CT: control target
= control target key end

     0   :  { %18 = vsyncpa [#allocation3], 0  ;;  %s4354_s0 = inlined_call_operand.hbm [shape: f32[2,8,128], index: 0, kind: input, shape index: {}]   ;;  %s4355_s1 = inlined_call_operand.hbm [shape: bf16[128,384], index: 1, kind: input, shape index: {}]   ;;  %s4356_s2 = inlined_call_operand.vmem [shape: f32[1,384], index: 2, kind: input, shape index: {}]   ;;  %s4357_s3 = inlined_call_operand.hbm [shape: bf16[128,128], index: 3, kind: input, shape index: {}]   ;;  %s4358_s4 = inlined_call_operand.vmem [shape: f32[1,128], index: 4, kind: input, shape index: {}]   ;;  %s4359_s5 = inlined_call_operand.vmem [shape: f32[1,128], index: 5, kind: input, shape index: {}]   ;;  %s4360_s6 = inlined_call_operand.vmem [shape: f32[1,128], index: 6, kind: input, shape index: {}]   ;;  %s4361_s7 = inlined_call_operand.hbm [shape: bf16[128,256], index: 7, kind: input, shape index: {}]   ;;  %s4362_s8 = inlined_call_operand.vmem [shape: f32[1,256], index: 8, kind: input, shape index: {}]   ;;  %s4363_s9 = inlined_call_operand.hbm [shape: bf16[256,128], index: 9, kind: input, shape index: {}]   ;;  %s4364_s10 = inlined_call_operand.vmem [shape: f32[1,128], index: 10, kind: input, shape index: {}]   ;;  %s4365_s11 = inlined_call_operand.vmem [shape: f32[1,128], index: 11, kind: input, shape index: {}]   ;;  %s4366_s12 = inlined_call_operand.vmem [shape: f32[1,128], index: 12, kind: input, shape index: {}]   ;;  %s4367_s13 = inlined_call_operand.hbm [shape: f32[2,8,128], index: 13, kind: output, shape index: {}]  }
   0x1   :  { %19 = vsyncpa [#allocation6], 0 }
   0x2   :  { %20 = vsyncpa [#allocation9], 0 }
   0x3   :  { %21 = vsyncpa [#allocation4], 0  ;;  %s3647_s25 = smov [#allocation5]   ;;  %s3507_s29 = scalar_lea.hbm %s4355_s1, 3072 }
   0x4   :  { %s39_s26 = sshll.u32 %s3647_s25, 4  ;;  %p3508_p0 = scmp.ne.s32.totalorder %s4355_s1, %s3507_s29  ;;  %s40_s26 = int_to_ptr.vmem [resolvable:$true] %s39_s26 }
   0x5   :  { %p3511_p1 = scmp.lt.u32.totalorder %s3507_s29, %s4355_s1 }
   0x7   :  { %p3513_p2 = pnand %p3511_p1, %p3508_p0 }
   0x9   :  { %3516 = shalt.err (!%p3513_p2)
}
   0xa   :  { %s3517_s17 = scalar_lea.vmem %s40_s26, 3072  ;;  %p3522_p4 = scmp.lt.s32.totalorder %s40_s26, %s40_s26 }
   0xb   :  { %p3518_p3 = scmp.ne.s32.totalorder %s40_s26, %s3517_s17  ;;  %p3523_p5 = scmp.lt.s32.totalorder %s3517_s17, %s3517_s17 }
   0xd   :  { %p3524_p6 = por %p3523_p5, %p3522_p4 }
   0xf   :  { %p3525_p7 = pnand %p3524_p6, %p3518_p3 }
  0x11   :  { %3528 = shalt.err (!%p3525_p7)
}
  0x12   :  { %s3648_s18 = smov 192   ;;  %s3649_s19 = smov 12  }
  0x13   :  { %45 = dma.hbm_to_vmem [thread:$0]  %s4355_s1, 3072, %s40_s26, [#allocation6], %s3648_s18, %s3648_s18, %s3649_s19  }
  0x14   :  { %s3650_s22 = smov [#allocation8]   ;;  %s3651_s24 = smov [#allocation2]  }
  0x15   :  { %s71_s23 = sshll.u32 %s3650_s22, 4  ;;  %s27_s25 = sshll.u32 %s3651_s24, 4  ;;  %s72_s23 = int_to_ptr.vmem [resolvable:$true] %s71_s23  ;;  %s28_s25 = int_to_ptr.vmem [resolvable:$true] %s27_s25 }
  0x16   :  { %s3529_s29 = scalar_lea.hbm %s4361_s7, 2048 }
  0x17   :  { %p3530_p8 = scmp.ne.s32.totalorder %s4361_s7, %s3529_s29  ;;  %p3533_p9 = scmp.lt.u32.totalorder %s3529_s29, %s4361_s7 }
  0x19   :  { %p3535_p10 = pnand %p3533_p9, %p3530_p8 }
  0x1b   :  { %3538 = shalt.err (!%p3535_p10)
}
  0x1c   :  { %s3539_s1 = scalar_lea.vmem %s72_s23, 2048  ;;  %p3544_p12 = scmp.lt.s32.totalorder %s72_s23, %s72_s23 }
  0x1d   :  { %p3540_p11 = scmp.ne.s32.totalorder %s72_s23, %s3539_s1  ;;  %p3545_p13 = scmp.lt.s32.totalorder %s3539_s1, %s3539_s1 }
  0x1f   :  { %p3546_p0 = por %p3545_p13, %p3544_p12 }
  0x21   :  { %p3547_p1 = pnand %p3546_p0, %p3540_p11 }
  0x23   :  { %3550 = shalt.err (!%p3547_p1)
}
  0x24   :  { %s3652_s26 = smov 128   ;;  %s3653_s17 = smov 8  }
  0x25   :  { %77 = dma.hbm_to_vmem [thread:$0]  %s4361_s7, 2048, %s72_s23, [#allocation9], %s3652_s26, %s3652_s26, %s3653_s17  }
  0x26   :  { %s3551_s22 = scalar_lea.hbm %s4354_s0, 256 }
  0x27   :  { %p3552_p2 = scmp.ne.s32.totalorder %s4354_s0, %s3551_s22  ;;  %p3555_p3 = scmp.lt.u32.totalorder %s3551_s22, %s4354_s0 }
  0x29   :  { %p3557_p4 = pnand %p3555_p3, %p3552_p2 }
  0x2b   :  { %3560 = shalt.err (!%p3557_p4)
}
  0x2c   :  { %s3561_s30 = scalar_lea.vmem %s28_s25, 256  ;;  %p3566_p6 = scmp.lt.s32.totalorder %s28_s25, %s28_s25 }
  0x2d   :  { %p3562_p5 = scmp.ne.s32.totalorder %s28_s25, %s3561_s30  ;;  %p3567_p7 = scmp.lt.s32.totalorder %s3561_s30, %s3561_s30 }
  0x2f   :  { %p3568_p8 = por %p3567_p7, %p3566_p6 }
  0x31   :  { %p3569_p9 = pnand %p3568_p8, %p3562_p5 }
  0x33   :  { %3572 = shalt.err (!%p3569_p9)
}
  0x34   :  { %33 = dma.hbm_to_vmem [thread:$0]  %s4354_s0, 256, %s28_s25, [#allocation3], %s3652_s26, %s3652_s26, %s3653_s17  }
  0x35   :  { %s3654_s14 = smov [#allocation7]   ;;  %s3573_s18 = scalar_lea.hbm %s4357_s3, 1024 }
  0x36   :  { %s53_s15 = sshll.u32 %s3654_s14, 4  ;;  %p3574_p10 = scmp.ne.s32.totalorder %s4357_s3, %s3573_s18  ;;  %s54_s15 = int_to_ptr.vmem [resolvable:$true] %s53_s15 }
  0x37   :  { %p3577_p11 = scmp.lt.u32.totalorder %s3573_s18, %s4357_s3 }
  0x39   :  { %p3579_p12 = pnand %p3577_p11, %p3574_p10 }
  0x3b   :  { %3582 = shalt.err (!%p3579_p12)
}
  0x3c   :  { %s3583_s24 = scalar_lea.vmem %s54_s15, 1024  ;;  %p3588_p0 = scmp.lt.s32.totalorder %s54_s15, %s54_s15 }
  0x3d   :  { %p3584_p13 = scmp.ne.s32.totalorder %s54_s15, %s3583_s24  ;;  %p3589_p1 = scmp.lt.s32.totalorder %s3583_s24, %s3583_s24 }
  0x3f   :  { %p3590_p2 = por %p3589_p1, %p3588_p0 }
  0x41   :  { %p3591_p3 = pnand %p3590_p2, %p3584_p13 }
  0x43   :  { %3594 = shalt.err (!%p3591_p3)
}
  0x44   :  { %s3655_s0 = smov 64   ;;  %s3656_s25 = smov 4  }
  0x45   :  { %59 = dma.hbm_to_vmem [thread:$0]  %s4357_s3, 1024, %s54_s15, [#allocation6], %s3655_s0, %s3655_s0, %s3656_s25  }
  0x46   :  { %s3657_s29 = smov [#allocation10]   ;;  %s3595_s14 = scalar_lea.hbm %s4363_s9, 2048 }
  0x47   :  { %s85_s30 = sshll.u32 %s3657_s29, 4  ;;  %p3596_p4 = scmp.ne.s32.totalorder %s4363_s9, %s3595_s14  ;;  %s86_s30 = int_to_ptr.vmem [resolvable:$true] %s85_s30 }
  0x48   :  { %p3599_p5 = scmp.lt.u32.totalorder %s3595_s14, %s4363_s9 }
  0x4a   :  { %p3601_p6 = pnand %p3599_p5, %p3596_p4 }
  0x4c   :  { %3604 = shalt.err (!%p3601_p6)
}
  0x4d   :  { %s3605_s20 = scalar_lea.vmem %s86_s30, 2048  ;;  %p3610_p8 = scmp.lt.s32.totalorder %s86_s30, %s86_s30 }
  0x4e   :  { %p3606_p7 = scmp.ne.s32.totalorder %s86_s30, %s3605_s20  ;;  %p3611_p9 = scmp.lt.s32.totalorder %s3605_s20, %s3605_s20 }
  0x50   :  { %p3612_p10 = por %p3611_p9, %p3610_p8 }
  0x52   :  { %p3613_p11 = pnand %p3612_p10, %p3606_p7 }
  0x54   :  { %3616 = shalt.err (!%p3613_p11)
}
  0x55   :  { %91 = dma.hbm_to_vmem [thread:$0]  %s4363_s9, 2048, %s86_s30, [#allocation9], %s3655_s0, %s3655_s0, %s3656_s25  }
  0x56   :  { %3639 = dma.done.wait [#allocation3], 256  }
  0x57   :  { %3640 = vsyncadd [#allocation3], 4294967040 }
  0x58   :  { %3641 = dma.done.wait [#allocation6], 4096  }
  0x59   :  { %3642 = vsyncadd [#allocation6], 4294963200 }
  0x5a   :  { %3643 = dma.done.wait [#allocation9], 4096  }
  0x5b   :  { %3644 = vsyncadd [#allocation9], 4294963200  ;;  %v3658_v0 = vmov 0   ;;  %v3659_v1 = vmov 0.0   ;;  %vm3660_vm0 = vmmov 0   ;;  %v218_v23 = vld [vmem:[#allocation2] sm:$0xff]  ;;  %v222_v29 = vlaneseq }
  0x5c   :  { %397 = vmatprep.mubr.bf16.mxu0 %v3658_v0  ;;  %3060 = vmatprep.subr.bf16.mxu1 %v3659_v1  ;;  %v3353_v2 = vld [vmem:[#allocation5 + $0x4] ss:$12 sps:$4 sm:$0xff]   ;;  %v3355_v3 = vld [vmem:[#allocation5] ss:$12 sps:$4 sm:$0xff]   ;;  %v3356_v4 = vld [vmem:[#allocation5 + $0x1c] ss:$12 sps:$4 sm:$0xff]  }
  0x5d   :  { %3076 = vmatprep.mubr.msk.bf16.mxu1 %vm3660_vm0, %v3659_v1  ;;  %365 = vmatprep.subr.bf16.mxu0 %v3353_v2  ;;  %v3358_v5 = vld [vmem:[#allocation5 + $0x18] ss:$12 sps:$4 sm:$0xff]   ;;  %v3359_v6 = vld [vmem:[#allocation5 + $0x34] ss:$12 sps:$4 sm:$0xff]   ;;  %v3361_v7 = vld [vmem:[#allocation5 + $0x30] ss:$12 sps:$4 sm:$0xff]  }
  0x5e   :  { %366 = vmatpush1.bf16.msra.mxu0 %v3355_v3  ;;  %v3362_v8 = vld [vmem:[#allocation5 + $0x4c] ss:$12 sps:$4 sm:$0xff]   ;;  %v3364_v9 = vld [vmem:[#allocation5 + $0x48] ss:$12 sps:$4 sm:$0xff]   ;;  %v3365_v10 = vld [vmem:[#allocation5 + $0x64] ss:$12 sps:$4 sm:$0xff]  }
  0x5f   :  { %367 = vmatprep.subr.bf16.mxu0 %v3356_v4  ;;  %v3377_v11 = vld [vmem:[#allocation5 + $0x8] ss:$12 sps:$4 sm:$0xff]   ;;  %v3378_v12 = vld [vmem:[#allocation5 + $0x20] ss:$12 sps:$4 sm:$0xff]   ;;  %v3379_v15 = vld [vmem:[#allocation5 + $0x38] ss:$12 sps:$4 sm:$0xff]  }
  0x60   :  { %3061 = vmatpush3.bf16.msra.mxu1 %v3377_v11  ;;  %v3367_v13 = vld [vmem:[#allocation5 + $0x60] ss:$12 sps:$4 sm:$0xff]   ;;  %v3368_v14 = vld [vmem:[#allocation5 + $0x7c] ss:$12 sps:$4 sm:$0xff]   ;;  %v3370_v16 = vld [vmem:[#allocation5 + $0x78] ss:$12 sps:$4 sm:$0xff]  }
  0x61   :  { %3062 = vmatprep.subr.bf16.mxu1 %v3659_v1  ;;  %v3371_v17 = vld [vmem:[#allocation5 + $0x94] ss:$12 sps:$4 sm:$0xff]   ;;  %v3380_v18 = vld [vmem:[#allocation5 + $0x50] ss:$12 sps:$4 sm:$0xff]   ;;  %v3374_v20 = vld [vmem:[#allocation5 + $0xac] ss:$12 sps:$4 sm:$0xff]  }
  0x62   :  { %368 = vmatpush1.bf16.msra.mxu0 %v3358_v5  ;;  %v3373_v19 = vld [vmem:[#allocation5 + $0x90] ss:$12 sps:$4 sm:$0xff]   ;;  %v3381_v21 = vld [vmem:[#allocation5 + $0x68] ss:$12 sps:$4 sm:$0xff]   ;;  %v3382_v25 = vld [vmem:[#allocation5 + $0x80] ss:$12 sps:$4 sm:$0xff]  }
  0x63   :  { %369 = vmatprep.subr.bf16.mxu0 %v3359_v6  ;;  %v3376_v22 = vld [vmem:[#allocation5 + $0xa8] ss:$12 sps:$4 sm:$0xff]   ;;  %v219_v24 = vld [vmem:[#allocation2 + $0x8] sm:$0xff]  ;;  %v3825_v30 = vshrl.u32 %v222_v29, 7  ;;  %v146_v32 = vld [vmem:[%s4356_s2] sm:$0x7] }
  0x64   :  { %3063 = vmatpush3.bf16.msra.mxu1 %v3378_v12  ;;  %v220_v26 = vpack.c.bf16 %v219_v24, %v218_v23  ;;  %v3383_v27 = vld [vmem:[#allocation5 + $0x98] ss:$12 sps:$4 sm:$0xff]   ;;  %v3384_v28 = vld [vmem:[#allocation5 + $0xb0] ss:$12 sps:$4 sm:$0xff]   ;;  %vm629_vm1 = vcmask 130048   ;;  %s3661_s22 = smov 96  }
  0x65   :  { %3064 = vmatprep.subr.bf16.mxu1 %v3659_v1  ;;  %v228_v31 = vsub.s32 1, %v3825_v30  ;;  %v224_v33 = vsub.s32 0, %v3825_v30  ;;  %s3662_s24 = smov 112   ;;  %s3663_s2 = smov 80   ;;  %v232_v47 = vsub.s32 2, %v3825_v30  ;;  %vm1562_vm2 = vcmask 1043456  }
  0x66   :  { %370 = vmatpush1.bf16.msra.mxu0 %v3361_v7  ;;  %s3664_s25 = smov 48   ;;  %s3665_s27 = smov 32   ;;  %vm1366_vm3 = vcmask 64512   ;;  %vm2325_vm4 = vcmask 261120   ;;  %vm2327_vm5 = vcmask 392192   ;;  %vm2329_vm6 = vcmask 523264  }
  0x67   :  { %371 = vmatprep.subr.bf16.mxu0 %v3362_v8  ;;  %v229_v34 = vrot.slane %v146_v32, %v228_v31  ;;  %v225_v37 = vrot.slane %v146_v32, %v224_v33  ;;  %s3666_s28 = smov 16   ;;  %v233_v50 = vrot.slane %v146_v32, %v232_v47  ;;  %vm2331_vm7 = vcmask 654336   ;;  %v2937_v30 = vld [vmem:[%s4364_s10] ss:$0 sm:$0xff]  ;;  %s3667_s19 = smov [#allocation11]  }
  0x68   :  { %3065 = vmatpush3.bf16.msra.mxu1 %v3379_v15  ;;  %vm2333_vm8 = vcmask 785408   ;;  %vm2335_vm9 = vcmask 916480   ;;  %s2840_s20 = sshll.u32 %s3667_s19, 4  ;;  %s2841_s20 = int_to_ptr.vmem [resolvable:$true] %s2840_s20 }
  0x69   :  { %3066 = vmatprep.subr.bf16.mxu1 %v3659_v1  ;;  %s3617_s3 = scalar_lea.vmem %s2841_s20, 256  ;;  %p3622_p13 = scmp.lt.s32.totalorder %s2841_s20, %s2841_s20 }
  0x6a   :  { %372 = vmatpush1.bf16.msra.mxu0 %v3364_v9  ;;  %p3618_p12 = scmp.ne.s32.totalorder %s2841_s20, %s3617_s3  ;;  %p3623_p0 = scmp.lt.s32.totalorder %s3617_s3, %s3617_s3 }
  0x6b   :  { %373 = vmatprep.subr.bf16.mxu0 %v3365_v10 }
  0x6c   :  { %3067 = vmatpush3.bf16.msra.mxu1 %v3380_v18  ;;  %p3624_p1 = por %p3623_p0, %p3622_p13 }
  0x6d   :  { %3068 = vmatprep.subr.bf16.mxu1 %v3659_v1 }
  0x6e   :  { %374 = vmatpush1.bf16.msra.mxu0 %v3367_v13  ;;  %p3625_p2 = pnand %p3624_p1, %p3618_p12 }
  0x6f   :  { %375 = vmatprep.subr.bf16.mxu0 %v3368_v14 }
  0x70   :  { %3069 = vmatpush3.bf16.msra.mxu1 %v3381_v21 }
  0x71   :  { %3070 = vmatprep.subr.bf16.mxu1 %v3659_v1 }
  0x72   :  { %376 = vmatpush1.bf16.msra.mxu0 %v3370_v16 }
  0x73   :  { %377 = vmatprep.subr.bf16.mxu0 %v3371_v17 }
  0x74   :  { %3071 = vmatpush3.bf16.msra.mxu1 %v3382_v25 }
  0x75   :  { %3072 = vmatprep.subr.bf16.mxu1 %v3659_v1 }
  0x76   :  { %378 = vmatpush1.bf16.msra.mxu0 %v3373_v19 }
  0x77   :  { %379 = vmatprep.subr.bf16.mxu0 %v3374_v20 }
  0x78   :  { %3073 = vmatpush3.bf16.msra.mxu1 %v3383_v27 }
  0x79   :  { %3074 = vmatprep.subr.bf16.mxu1 %v3659_v1 }
  0x7a   :  { %380 = vmatpush1.bf16.msra.mxu0 %v3376_v22 }
  0x7b   :  { %3104 = vmatprep.subr.bf16.mxu0 %v3659_v1 }
  0x7c   :  { %3075 = vmatpush3.bf16.msra.mxu1 %v3384_v28 }
  0x7d   :  { %398 = vmatmul.mubr.bf16.vlgmr.msra.gmra.mrb[0].mxu0 %v220_v26  ;;  %3080 = vmatprep.subr.bf16.mxu1 %v3659_v1 }
  0x7e   :  { %3106 = vmatprep.mubr.msk.bf16.mxu0 %vm3660_vm0, %v3659_v1 }
  0x7f   :  { %3077 = vmatmul.mubr.bf16.vlgmr.msra.gmra.mrb[0].mxu1 %v220_v26 }
  0x80   :  { %3082 = vmatprep.mubr.msk.bf16.mxu1 %vm3660_vm0, %v3659_v1 }
 0x150   :  { %v399_v35 = vpop.f32.mrb[0].mxu0 }
 0x151   :  { %v401_v36 = vpop.f32.mrb[1].mxu0  ;;  %v400_v42 = vadd.f32 %v399_v35, %v225_v37 }
 0x152   :  { %v402_v38 = vadd.f32 %v401_v36, %v229_v34  ;;  %v403_v39 = vpop.f32.mrb[2].mxu0  ;;  %v442_v48 = vpop.f32.mrb[0].mxu1 }
 0x153   :  { %v405_v40 = vpop.f32.mrb[3].mxu0  ;;  %v493_v44 = vpack.c.bf16 %v400_v42, %v400_v42  ;;  %v3861_v46 = vadd.f32 %v403_v39, %v225_v37  ;;  %v3078_v49 = vpop.f32.mrb[1].mxu1  ;;  %v3888_v51 = vadd.f32 %v442_v48, %v233_v50 }
 0x154   :  { %513 = vrot.lane.b32.xlu1 %v402_v38, %s3661_s22  ;;  %510 = vrot.lane.b32.xlu0 %v402_v38, %s3662_s24  ;;  %v553_v41 = vpack.c.bf16 %v402_v38, %v402_v38  ;;  %v3855_v45 = vadd.f32 %v405_v40, %v229_v34  ;;  %v445_v52 = vpop.f32.mrb[2].mxu1 }
 0x155   :  { %v3079_v53 = vpop.f32.mrb[3].mxu1  ;;  %v3896_v54 = vadd.f32 %v445_v52, %v233_v50  ;;  %v501_v37 = vpack.c.bf16 %v3861_v46, %v3861_v46 }
 0x156   :  { %v634_v43 = vsel %vm629_vm1, %v553_v41, 0  ;;  %v561_v20 = vpack.c.bf16 %v3855_v45, %v3855_v45 }
 0x157   :  { %3081 = vmatpush3.bf16.xpose.msra.mxu1 %v634_v43  ;;  %v3313_v55 = vpack.i.bf16 %v3896_v54, %v3888_v51 }
 0x158   :  { %453 = vrot.lane.b32.xlu1 %v400_v42, %s3661_s22  ;;  %450 = vrot.lane.b32.xlu0 %v400_v42, %s3662_s24  ;;  %v1002_v26 = vsel %vm629_vm1, %v561_v20, 0 }
 0x159   :  { %3086 = vmatprep.subr.bf16.mxu1 %v3659_v1 }
 0x15c   :  { %519 = vrot.lane.b32.xlu1 %v402_v38, %s3655_s0  ;;  %516 = vrot.lane.b32.xlu0 %v402_v38, %s3663_s2 }
 0x15e   :  { %3083 = vmatmul.mubr.msk.bf16.vlgmr.msra.gmra.mrb[4].mxu1 %vm629_vm1, %v493_v44 }
 0x15f   :  { %3088 = vmatprep.mubr.msk.bf16.mxu1 %vm3660_vm0, %v3659_v1 }
 0x160   :  { %522 = vrot.lane.b32.xlu1 %v402_v38, %s3664_s25  ;;  %456 = vrot.lane.b32.xlu0 %v400_v42, %s3663_s2 }
 0x164   :  { %525 = vrot.lane.b32.xlu1 %v402_v38, %s3665_s27  ;;  %459 = vrot.lane.b32.xlu0 %v400_v42, %s3655_s0 }
 0x168   :  { %528 = vrot.lane.b32.xlu1 %v402_v38, %s3666_s28  ;;  %462 = vrot.lane.b32.xlu0 %v400_v42, %s3664_s25 }
 0x16c   :  { %468 = vrot.lane.b32.xlu1 %v400_v42, %s3666_s28  ;;  %465 = vrot.lane.b32.xlu0 %v400_v42, %s3665_s27 }
 0x170   :  { %535 = vrot.lane.b32.xlu1 %v3855_v45, %s3661_s22  ;;  %532 = vrot.lane.b32.xlu0 %v3855_v45, %s3662_s24 }
 0x174   :  { %538 = vrot.lane.b32.xlu1 %v3855_v45, %s3663_s2  ;;  %472 = vrot.lane.b32.xlu0 %v3861_v46, %s3662_s24 }
 0x178   :  { %541 = vrot.lane.b32.xlu1 %v3855_v45, %s3655_s0  ;;  %475 = vrot.lane.b32.xlu0 %v3861_v46, %s3661_s22 }
 0x17c   :  { %544 = vrot.lane.b32.xlu1 %v3855_v45, %s3664_s25  ;;  %478 = vrot.lane.b32.xlu0 %v3861_v46, %s3663_s2 }
 0x180   :  { %547 = vrot.lane.b32.xlu1 %v3855_v45, %s3665_s27  ;;  %481 = vrot.lane.b32.xlu0 %v3861_v46, %s3655_s0 }
 0x184   :  { %550 = vrot.lane.b32.xlu1 %v3855_v45, %s3666_s28  ;;  %484 = vrot.lane.b32.xlu0 %v3861_v46, %s3664_s25 }
 0x188   :  { %490 = vrot.lane.b32.xlu1 %v3861_v46, %s3666_s28  ;;  %487 = vrot.lane.b32.xlu0 %v3861_v46, %s3665_s27 }
 0x18c   :  { %573 = vrot.lane.b32.xlu0 %v3888_v51, %s3661_s22  ;;  %3314 = vrot.lane.b32.xlu1 %v3313_v55, %s3662_s24 }
 0x190   :  { %582 = vrot.lane.b32.xlu0 %v3888_v51, %s3664_s25  ;;  %576 = vrot.lane.b32.xlu1 %v3888_v51, %s3663_s2 }
 0x194   :  { %588 = vrot.lane.b32.xlu0 %v3888_v51, %s3666_s28  ;;  %579 = vrot.lane.b32.xlu1 %v3888_v51, %s3655_s0 }
 0x198   :  { %585 = vrot.lane.b32.xlu1 %v3888_v51, %s3665_s27 }
 0x1c6   :  { %v514_v56 = vpop.permute.xlu1 %513  ;;  %v511_v57 = vpop.permute.xlu0 %510 }
 0x1c7   :  { %v554_v58 = vpack.c.bf16 %v511_v57, %v511_v57  ;;  %v555_v62 = vpack.c.bf16 %v514_v56, %v514_v56 }
 0x1c9   :  { %v680_v59 = vsel %vm629_vm1, %v554_v58, 0  ;;  %v726_v5 = vsel %vm629_vm1, %v555_v62, 0  ;;  %v613_v62 = vpack.c.bf16 %v3888_v51, %v3888_v51 }
 0x1ca   :  { %v454_v60 = vpop.permute.xlu1 %453  ;;  %v451_v61 = vpop.permute.xlu0 %450  ;;  %3087 = vmatpush3.bf16.xpose.msra.mxu1 %v680_v59 }
 0x1cb   :  { %3092 = vmatprep.subr.bf16.mxu1 %v3659_v1  ;;  %v494_v3 = vpack.c.bf16 %v451_v61, %v451_v61  ;;  %v495_v12 = vpack.c.bf16 %v454_v60, %v454_v60 }
 0x1ce   :  { %v520_v63 = vpop.permute.xlu1 %519  ;;  %v517_v2 = vpop.permute.xlu0 %516 }
 0x1cf   :  { %v557_v4 = vpack.c.bf16 %v520_v63, %v520_v63  ;;  %v556_v9 = vpack.c.bf16 %v517_v2, %v517_v2 }
 0x1d1   :  { %v818_v6 = vsel %vm629_vm1, %v557_v4, 0  ;;  %3089 = vmatmul.mubr.msk.bf16.vlgmr.msra.gmra.mrb[8].mxu1 %vm629_vm1, %v494_v3  ;;  %v772_v15 = vsel %vm629_vm1, %v556_v9, 0  ;;  %v1564_v4 = vsel %vm1562_vm2, %v613_v62, 0 }
 0x1d2   :  { %3105 = vmatpush3.bf16.xpose.msra.mxu0 %v818_v6  ;;  %v523_v7 = vpop.permute.xlu1 %522  ;;  %v457_v8 = vpop.permute.xlu0 %456  ;;  %3093 = vmatpush3.bf16.xpose.msra.mxu1 %v726_v5 }
 0x1d3   :  { %3094 = vmatprep.mubr.msk.bf16.mxu1 %vm3660_vm0, %v3659_v1  ;;  %3098 = vmatprep.subr.bf16.mxu1 %v3659_v1  ;;  %v558_v19 = vpack.c.bf16 %v523_v7, %v523_v7  ;;  %v496_v23 = vpack.c.bf16 %v457_v8, %v457_v8 }
 0x1d4   :  { %3116 = vmatprep.subr.bf16.mxu0 %v3659_v1 }
 0x1d5   :  { %v864_v25 = vsel %vm629_vm1, %v558_v19, 0 }
 0x1d6   :  { %v526_v10 = vpop.permute.xlu1 %525  ;;  %v460_v11 = vpop.permute.xlu0 %459 }
 0x1d7   :  { %v559_v13 = vpack.c.bf16 %v526_v10, %v526_v10  ;;  %v497_v14 = vpack.c.bf16 %v460_v11, %v460_v11 }
 0x1d9   :  { %v910_v16 = vsel %vm629_vm1, %v559_v13, 0  ;;  %3095 = vmatmul.mubr.msk.bf16.vlgmr.msra.gmra.mrb[12].mxu1 %vm629_vm1, %v495_v12  ;;  %3107 = vmatmul.mubr.msk.bf16.vlgmr.msra.gmra.mrb[4].mxu0 %vm629_vm1, %v497_v14 }
 0x1da   :  { %v529_v17 = vpop.permute.xlu1 %528  ;;  %3117 = vmatpush3.bf16.xpose.msra.mxu0 %v910_v16  ;;  %v463_v18 = vpop.permute.xlu0 %462  ;;  %3099 = vmatpush3.bf16.xpose.msra.mxu1 %v772_v15 }
 0x1db   :  { %3100 = vmatprep.mubr.msk.bf16.mxu1 %vm3660_vm0, %v3659_v1  ;;  %3118 = vmatprep.mubr.msk.bf16.mxu0 %vm3660_vm0, %v3659_v1  ;;  %v560_v29 = vpack.c.bf16 %v529_v17, %v529_v17  ;;  %v498_v36 = vpack.c.bf16 %v463_v18, %v463_v18 }
 0x1dc   :  { %3110 = vmatprep.subr.bf16.mxu1 %v3659_v1  ;;  %3128 = vmatprep.subr.bf16.mxu0 %v3659_v1 }
 0x1dd   :  { %v956_v38 = vsel %vm629_vm1, %v560_v29, 0 }
 0x1de   :  { %v469_v21 = vpop.permute.xlu1 %468  ;;  %v466_v22 = vpop.permute.xlu0 %465 }
 0x1df   :  { %v499_v24 = vpack.c.bf16 %v466_v22, %v466_v22  ;;  %v500_v46 = vpack.c.bf16 %v469_v21, %v469_v21 }
 0x1e1   :  { %3101 = vmatmul.mubr.msk.bf16.vlgmr.msra.gmra.mrb[16].mxu1 %vm629_vm1, %v496_v23  ;;  %3119 = vmatmul.mubr.msk.bf16.vlgmr.msra.gmra.mrb[8].mxu0 %vm629_vm1, %v499_v24 }
 0x1e2   :  { %v536_v27 = vpop.permute.xlu1 %535  ;;  %3129 = vmatpush3.bf16.xpose.msra.mxu0 %v1002_v26  ;;  %v533_v28 = vpop.permute.xlu0 %532  ;;  %3111 = vmatpush3.bf16.xpose.msra.mxu1 %v864_v25 }
 0x1e3   :  { %3112 = vmatprep.mubr.msk.bf16.mxu1 %vm3660_vm0, %v3659_v1  ;;  %3130 = vmatprep.mubr.msk.bf16.mxu0 %vm3660_vm0, %v3659_v1  ;;  %v563_v32 = vpack.c.bf16 %v536_v27, %v536_v27  ;;  %v562_v42 = vpack.c.bf16 %v533_v28, %v533_v28 }
 0x1e4   :  { %3122 = vmatprep.subr.bf16.mxu1 %v3659_v1  ;;  %3140 = vmatprep.subr.bf16.mxu0 %v3659_v1 }
 0x1e5   :  { %v1094_v39 = vsel %vm629_vm1, %v563_v32, 0  ;;  %v1048_v48 = vsel %vm629_vm1, %v562_v42, 0 }
 0x1e6   :  { %v539_v34 = vpop.permute.xlu1 %538  ;;  %v473_v35 = vpop.permute.xlu0 %472 }
 0x1e7   :  { %v564_v53 = vpack.c.bf16 %v539_v34, %v539_v34  ;;  %v502_v57 = vpack.c.bf16 %v473_v35, %v473_v35 }
 0x1e9   :  { %3113 = vmatmul.mubr.msk.bf16.vlgmr.msra.gmra.mrb[20].mxu1 %vm629_vm1, %v498_v36  ;;  %3131 = vmatmul.mubr.msk.bf16.vlgmr.msra.gmra.mrb[12].mxu0 %vm629_vm1, %v501_v37  ;;  %v1140_v59 = vsel %vm629_vm1, %v564_v53, 0 }
 0x1ea   :  { %v542_v40 = vpop.permute.xlu1 %541  ;;  %3141 = vmatpush3.bf16.xpose.msra.mxu0 %v1094_v39  ;;  %v476_v41 = vpop.permute.xlu0 %475  ;;  %3123 = vmatpush3.bf16.xpose.msra.mxu1 %v956_v38 }
 0x1eb   :  { %3124 = vmatprep.mubr.msk.bf16.mxu1 %vm3660_vm0, %v3659_v1  ;;  %3142 = vmatprep.mubr.msk.bf16.mxu0 %vm3660_vm0, %v3659_v1  ;;  %v565_v43 = vpack.c.bf16 %v542_v40, %v542_v40  ;;  %v503_v47 = vpack.c.bf16 %v476_v41, %v476_v41 }
 0x1ec   :  { %3134 = vmatprep.subr.bf16.mxu1 %v3659_v1  ;;  %3152 = vmatprep.subr.bf16.mxu0 %v3659_v1 }
 0x1ed   :  { %v1186_v49 = vsel %vm629_vm1, %v565_v43, 0 }
 0x1ee   :  { %v545_v44 = vpop.permute.xlu1 %544  ;;  %v479_v45 = vpop.permute.xlu0 %478 }
 0x1ef   :  { %v566_v63 = vpack.c.bf16 %v545_v44, %v545_v44  ;;  %v504_v2 = vpack.c.bf16 %v479_v45, %v479_v45 }
 0x1f1   :  { %3125 = vmatmul.mubr.msk.bf16.vlgmr.msra.gmra.mrb[24].mxu1 %vm629_vm1, %v500_v46  ;;  %3143 = vmatmul.mubr.msk.bf16.vlgmr.msra.gmra.mrb[16].mxu0 %vm629_vm1, %v503_v47  ;;  %v1232_v5 = vsel %vm629_vm1, %v566_v63, 0 }
 0x1f2   :  { %v548_v50 = vpop.permute.xlu1 %547  ;;  %3153 = vmatpush3.bf16.xpose.msra.mxu0 %v1186_v49  ;;  %v482_v52 = vpop.permute.xlu0 %481  ;;  %3135 = vmatpush3.bf16.xpose.msra.mxu1 %v1048_v48 }
 0x1f3   :  { %3136 = vmatprep.mubr.msk.bf16.mxu1 %vm3660_vm0, %v3659_v1  ;;  %3154 = vmatprep.mubr.msk.bf16.mxu0 %vm3660_vm0, %v3659_v1  ;;  %v567_v55 = vpack.c.bf16 %v548_v50, %v548_v50  ;;  %v505_v58 = vpack.c.bf16 %v482_v52, %v482_v52 }
 0x1f4   :  { %3146 = vmatprep.subr.bf16.mxu1 %v3659_v1  ;;  %3164 = vmatprep.subr.bf16.mxu0 %v3659_v1 }
 0x1f5   :  { %v1278_v60 = vsel %vm629_vm1, %v567_v55, 0 }
 0x1f6   :  { %v485_v56 = vpop.permute.xlu0 %484  ;;  %v551_v6 = vpop.permute.xlu1 %550 }
 0x1f7   :  { %v568_v51 = vpack.c.bf16 %v551_v6, %v551_v6  ;;  %v506_v7 = vpack.c.bf16 %v485_v56, %v485_v56 }
 0x1f9   :  { %3137 = vmatmul.mubr.msk.bf16.vlgmr.msra.gmra.mrb[28].mxu1 %vm629_vm1, %v502_v57  ;;  %3155 = vmatmul.mubr.msk.bf16.vlgmr.msra.gmra.mrb[20].mxu0 %vm629_vm1, %v505_v58  ;;  %v1324_v8 = vsel %vm629_vm1, %v568_v51, 0 }
 0x1fa   :  { %3165 = vmatpush3.bf16.xpose.msra.mxu0 %v1278_v60  ;;  %3147 = vmatpush3.bf16.xpose.msra.mxu1 %v1140_v59  ;;  %v488_v61 = vpop.permute.xlu0 %487  ;;  %v491_v9 = vpop.permute.xlu1 %490 }
 0x1fb   :  { %3148 = vmatprep.mubr.msk.bf16.mxu1 %vm3660_vm0, %v3659_v1  ;;  %3166 = vmatprep.mubr.msk.bf16.mxu0 %vm3660_vm0, %v3659_v1  ;;  %v507_v3 = vpack.c.bf16 %v488_v61, %v488_v61  ;;  %v508_v10 = vpack.c.bf16 %v491_v9, %v491_v9 }
 0x1fc   :  { %3158 = vmatprep.subr.bf16.mxu1 %v3659_v1  ;;  %3176 = vmatprep.subr.bf16.mxu0 %v3659_v1 }
 0x1fe   :  { %v3994_v16 = vpop.permute.xlu1 %3314  ;;  %v4003_v25 = vpop.permute.xlu0 %573 }
 0x1ff   :  { %v3316_v17 = vunpack.i.l.bf16 %v3994_v16 }
 0x201   :  { %3149 = vmatmul.mubr.msk.bf16.vlgmr.msra.gmra.mrb[32].mxu1 %vm629_vm1, %v504_v2  ;;  %3167 = vmatmul.mubr.msk.bf16.vlgmr.msra.gmra.mrb[24].mxu0 %vm629_vm1, %v507_v3  ;;  %v614_v18 = vpack.c.bf16 %v3316_v17, %v3316_v17 }
 0x202   :  { %3159 = vmatpush3.bf16.xpose.msra.mxu1 %v1232_v5  ;;  %3160 = vmatprep.mubr.msk.bf16.mxu1 %vm3660_vm0, %v3659_v1  ;;  %v4013_v39 = vpop.permute.xlu0 %582 }
 0x203   :  { %3170 = vmatprep.subr.bf16.mxu1 %v3659_v1  ;;  %3177 = vmatpush3.bf16.msra.mxu0 %v1564_v4  ;;  %v1610_v19 = vsel %vm1562_vm2, %v614_v18, 0 }
 0x204   :  { %3178 = vmatprep.mubr.msk.bf16.mxu0 %vm3660_vm0, %v3659_v1  ;;  %3188 = vmatprep.subr.bf16.mxu0 %v3659_v1 }
 0x206   :  { %v4023_v50 = vpop.permute.xlu0 %588 }
 0x209   :  { %3161 = vmatmul.mubr.msk.bf16.vlgmr.msra.gmra.mrb[36].mxu1 %vm629_vm1, %v506_v7 }
 0x20a   :  { %3171 = vmatpush3.bf16.xpose.msra.mxu1 %v1324_v8  ;;  %3172 = vmatprep.mubr.msk.bf16.mxu1 %vm3660_vm0, %v3659_v1 }
 0x20b   :  { %3182 = vmatprep.subr.bf16.mxu1 %v3659_v1 }
 0x211   :  { %3173 = vmatmul.mubr.msk.bf16.vlgmr.msra.gmra.mrb[40].mxu1 %vm629_vm1, %v508_v10 }
 0x212   :  { %3184 = vmatprep.mubr.msk.bf16.mxu1 %vm3660_vm0, %v3659_v1  ;;  %3183 = vmatpush3.bf16.msra.mxu1 %v1610_v19 }
 0x213   :  { %3194 = vmatprep.subr.bf16.mxu1 %v3659_v1 }
 0x231   :  { %v3990_v11 = vpop.f32.mrb[4].mxu1 }
 0x232   :  { %v3084_v12 = vpop.f32.mrb[5].mxu1  ;;  %v1367_v13 = vsel %vm1366_vm3, %v3990_v11, -inf }
 0x233   :  { %1368 = vmax.xlane.f32.xlu0 %v1367_v13  ;;  %v673_v14 = vpop.f32.mrb[6].mxu1 }
 0x234   :  { %v3085_v15 = vpop.f32.mrb[7].mxu1 }
 0x2a4   :  { %v3999_v20 = vpop.f32.mrb[8].mxu1 }
 0x2a5   :  { %v3090_v21 = vpop.f32.mrb[9].mxu1  ;;  %v1370_v22 = vsel %vm1366_vm3, %v3999_v20, -inf }
 0x2a6   :  { %1371 = vmax.xlane.f32.xlu1 %v1370_v22  ;;  %v719_v23 = vpop.f32.mrb[10].mxu1 }
 0x2a7   :  { %v3091_v24 = vpop.f32.mrb[11].mxu1 }
 0x2ac   :  { %v4005_v26 = vpop.f32.mrb[12].mxu1  ;;  %v4007_v27 = vpop.f32.mrb[4].mxu0 }
 0x2ad   :  { %v3096_v28 = vpop.f32.mrb[13].mxu1  ;;  %v3108_v29 = vpop.f32.mrb[5].mxu0  ;;  %v1379_v32 = vsel %vm1366_vm3, %v4007_v27, -inf  ;;  %v1373_v34 = vsel %vm1366_vm3, %v4005_v26, -inf }
 0x2ae   :  { %v857_v35 = vpop.f32.mrb[6].mxu0  ;;  %1380 = vmax.xlane.f32.xlu1 %v1379_v32  ;;  %1374 = vmax.xlane.f32.xlu0 %v1373_v34  ;;  %v765_v36 = vpop.f32.mrb[14].mxu1 }
 0x2af   :  { %v3097_v37 = vpop.f32.mrb[15].mxu1  ;;  %v3109_v38 = vpop.f32.mrb[7].mxu0 }
 0x2b4   :  { %v4015_v40 = vpop.f32.mrb[8].mxu0  ;;  %v4017_v41 = vpop.f32.mrb[16].mxu1 }
 0x2b5   :  { %v3102_v42 = vpop.f32.mrb[17].mxu1  ;;  %v3120_v43 = vpop.f32.mrb[9].mxu0  ;;  %v1385_v44 = vsel %vm1366_vm3, %v4015_v40, -inf  ;;  %v1376_v45 = vsel %vm1366_vm3, %v4017_v41, -inf }
 0x2b6   :  { %v949_v46 = vpop.f32.mrb[10].mxu0  ;;  %1386 = vmax.xlane.f32.xlu1 %v1385_v44  ;;  %1377 = vmax.xlane.f32.xlu0 %v1376_v45  ;;  %v811_v47 = vpop.f32.mrb[18].mxu1 }
 0x2b7   :  { %v3103_v48 = vpop.f32.mrb[19].mxu1  ;;  %v3121_v49 = vpop.f32.mrb[11].mxu0 }
 0x2bc   :  { %v4025_v52 = vpop.f32.mrb[12].mxu0  ;;  %v4027_v53 = vpop.f32.mrb[20].mxu1 }
 0x2bd   :  { %v3114_v55 = vpop.f32.mrb[21].mxu1  ;;  %v3132_v56 = vpop.f32.mrb[13].mxu0  ;;  %v1391_v57 = vsel %vm1366_vm3, %v4025_v52, -inf  ;;  %v1382_v58 = vsel %vm1366_vm3, %v4027_v53, -inf }
 0x2be   :  { %v1041_v59 = vpop.f32.mrb[14].mxu0  ;;  %1392 = vmax.xlane.f32.xlu1 %v1391_v57  ;;  %1383 = vmax.xlane.f32.xlu0 %v1382_v58  ;;  %v903_v60 = vpop.f32.mrb[22].mxu1 }
 0x2bf   :  { %v3115_v61 = vpop.f32.mrb[23].mxu1  ;;  %v3133_v62 = vpop.f32.mrb[15].mxu0 }
 0x2c0   :  { %v1369_v63 = vpop.xlane.xlu0 %1368  ;;  %v4074_v61 = vpop.permute.xlu1 %576 }
 0x2c1   :  { %v1415_v2 = vsub.f32 %v3990_v11, %v1369_v63 }
 0x2c3   :  { %v1431_v13 = vmul.f32 1.442695, %v1415_v2 }
 0x2c4   :  { %v4034_v3 = vpop.f32.mrb[24].mxu1  ;;  %v4036_v4 = vpop.f32.mrb[16].mxu0 }
 0x2c5   :  { %v3126_v5 = vpop.f32.mrb[25].mxu1  ;;  %v3144_v6 = vpop.f32.mrb[17].mxu0  ;;  %v1397_v51 = vsel %vm1366_vm3, %v4036_v4, -inf  ;;  %v1388_v7 = vsel %vm1366_vm3, %v4034_v3, -inf  ;;  %3433 = vpow2.f32 %v1431_v13 }
 0x2c6   :  { %v1133_v8 = vpop.f32.mrb[18].mxu0  ;;  %1398 = vmax.xlane.f32.xlu1 %v1397_v51  ;;  %1389 = vmax.xlane.f32.xlu0 %v1388_v7  ;;  %v995_v9 = vpop.f32.mrb[26].mxu1 }
 0x2c7   :  { %v3127_v10 = vpop.f32.mrb[27].mxu1  ;;  %v3145_v12 = vpop.f32.mrb[19].mxu0 }
 0x2c8   :  { %v4076_v62 = vpop.permute.xlu1 %579 }
 0x2cc   :  { %v4042_v11 = vpop.f32.mrb[28].mxu1  ;;  %v4044_v14 = vpop.f32.mrb[20].mxu0 }
 0x2cd   :  { %v3138_v15 = vpop.f32.mrb[29].mxu1  ;;  %v3156_v17 = vpop.f32.mrb[21].mxu0  ;;  %v1403_v18 = vsel %vm1366_vm3, %v4044_v14, -inf  ;;  %v1394_v19 = vsel %vm1366_vm3, %v4042_v11, -inf }
 0x2ce   :  { %v1225_v21 = vpop.f32.mrb[22].mxu0  ;;  %1404 = vmax.xlane.f32.xlu1 %v1403_v18  ;;  %1395 = vmax.xlane.f32.xlu0 %v1394_v19  ;;  %v1087_v22 = vpop.f32.mrb[30].mxu1 }
 0x2cf   :  { %v3139_v23 = vpop.f32.mrb[31].mxu1  ;;  %v3157_v24 = vpop.f32.mrb[23].mxu0 }
 0x2d0   :  { %v4058_v37 = vpop.eup %3433  ;;  %v4078_v63 = vpop.permute.xlu1 %585 }
 0x2d1   :  { %v1463_v45 = vsel %vm1366_vm3, %v4058_v37, 0.0 }
 0x2d4   :  { %v4050_v28 = vpop.f32.mrb[32].mxu1  ;;  %v4052_v29 = vpop.f32.mrb[24].mxu0 }
 0x2d5   :  { %v3150_v32 = vpop.f32.mrb[33].mxu1  ;;  %v3168_v34 = vpop.f32.mrb[25].mxu0  ;;  %v1409_v35 = vsel %vm1366_vm3, %v4052_v29, -inf  ;;  %v1400_v36 = vsel %vm1366_vm3, %v4050_v28, -inf }
 0x2d6   :  { %v1317_v38 = vpop.f32.mrb[26].mxu0  ;;  %1410 = vmax.xlane.f32.xlu1 %v1409_v35  ;;  %1401 = vmax.xlane.f32.xlu0 %v1400_v36  ;;  %v1179_v42 = vpop.f32.mrb[34].mxu1 }
 0x2d7   :  { %v3151_v43 = vpop.f32.mrb[35].mxu1  ;;  %v3169_v44 = vpop.f32.mrb[27].mxu0 }
 0x2da   :  { %1464 = vadd.xlane.f32.xlu1 %v1463_v45 }
 0x2dc   :  { %v4062_v46 = vpop.f32.mrb[36].mxu1 }
 0x2dd   :  { %v3162_v47 = vpop.f32.mrb[37].mxu1  ;;  %v1406_v48 = vsel %vm1366_vm3, %v4062_v46, -inf }
 0x2de   :  { %1407 = vmax.xlane.f32.xlu0 %v1406_v48  ;;  %v1271_v49 = vpop.f32.mrb[38].mxu1 }
 0x2df   :  { %v3163_v55 = vpop.f32.mrb[39].mxu1 }
 0x2e4   :  { %v4066_v56 = vpop.f32.mrb[40].mxu1 }
 0x2e5   :  { %v3174_v57 = vpop.f32.mrb[41].mxu1  ;;  %v1412_v60 = vsel %vm1366_vm3, %v4066_v56, -inf }
 0x2e6   :  { %v1363_v58 = vpop.f32.mrb[42].mxu1 }
 0x2e7   :  { %v3175_v59 = vpop.f32.mrb[43].mxu1 }
 0x2eb   :  { %598 = vrot.lane.b32.xlu1 %v3896_v54, %s3663_s2 }
 0x2f4   :  { %595 = vrot.lane.b32.xlu0 %v3896_v54, %s3661_s22 }
 0x313   :  { %1413 = vmax.xlane.f32.xlu0 %v1412_v60 }
 0x333   :  { %v1372_v2 = vpop.xlane.xlu1 %1371 }
 0x334   :  { %v1416_v5 = vsub.f32 %v3999_v20, %v1372_v2 }
 0x336   :  { %v1433_v6 = vmul.f32 1.442695, %v1416_v5 }
 0x338   :  { %3435 = vpow2.f32 %v1433_v6 }
 0x33b   :  { %v1381_v51 = vpop.xlane.xlu1 %1380  ;;  %v1375_v7 = vpop.xlane.xlu0 %1374 }
 0x33c   :  { %v1419_v8 = vsub.f32 %v4007_v27, %v1381_v51  ;;  %v1417_v9 = vsub.f32 %v4005_v26, %v1375_v7 }
 0x33e   :  { %v1439_v10 = vmul.f32 1.442695, %v1419_v8  ;;  %v1435_v12 = vmul.f32 1.442695, %v1417_v9 }
 0x340   :  { %3437 = vpow2.f32 %v1439_v10 }
 0x341   :  { %3439 = vpow2.f32 %v1435_v12 }
 0x342   :  { %v4083_v13 = vpop.eup %3435 }
 0x343   :  { %v1387_v15 = vpop.xlane.xlu1 %1386  ;;  %v1378_v17 = vpop.xlane.xlu0 %1377  ;;  %v1466_v18 = vsel %vm1366_vm3, %v4083_v13, 0.0 }
 0x344   :  { %v1421_v20 = vsub.f32 %v4015_v40, %v1387_v15  ;;  %v1418_v19 = vsub.f32 %v4017_v41, %v1378_v17  ;;  %1467 = vadd.xlane.f32.xlu0 %v1466_v18  ;;  %v615_v17 = vpack.c.bf16 %v4003_v25, %v4003_v25 }
 0x346   :  { %v1443_v21 = vmul.f32 1.442695, %v1421_v20  ;;  %v1437_v27 = vmul.f32 1.442695, %v1418_v19 }
 0x348   :  { %3441 = vpow2.f32 %v1443_v21  ;;  %v1656_v21 = vsel %vm1562_vm2, %v615_v17, 0 }
 0x349   :  { %3443 = vpow2.f32 %v1437_v27 }
 0x34a   :  { %v4089_v26 = vpop.eup %3437 }
 0x34b   :  { %v1384_v22 = vpop.xlane.xlu0 %1383  ;;  %v1475_v23 = vsel %vm1366_vm3, %v4089_v26, 0.0  ;;  %v4093_v24 = vpop.eup %3439 }
 0x34c   :  { %v1420_v32 = vsub.f32 %v4027_v53, %v1384_v22  ;;  %1476 = vadd.xlane.f32.xlu1 %v1475_v23  ;;  %v1469_v40 = vsel %vm1366_vm3, %v4093_v24, 0.0  ;;  %v1393_v53 = vpop.xlane.xlu1 %1392 }
 0x34d   :  { %v1423_v8 = vsub.f32 %v4025_v52, %v1393_v53 }
 0x34e   :  { %v1441_v34 = vmul.f32 1.442695, %v1420_v32 }
 0x34f   :  { %v1447_v10 = vmul.f32 1.442695, %v1423_v8 }
 0x350   :  { %1470 = vadd.xlane.f32.xlu1 %v1469_v40  ;;  %3445 = vpow2.f32 %v1441_v34 }
 0x352   :  { %v4098_v41 = vpop.eup %3441 }
 0x353   :  { %v1390_v35 = vpop.xlane.xlu0 %1389  ;;  %v1481_v36 = vsel %vm1366_vm3, %v4098_v41, 0.0  ;;  %v4102_v38 = vpop.eup %3443 }
 0x354   :  { %v1422_v42 = vsub.f32 %v4034_v3, %v1390_v35  ;;  %1482 = vadd.xlane.f32.xlu0 %v1481_v36  ;;  %v1472_v44 = vsel %vm1366_vm3, %v4102_v38, 0.0  ;;  %v1399_v47 = vpop.xlane.xlu1 %1398 }
 0x356   :  { %v1445_v43 = vmul.f32 1.442695, %v1422_v42 }
 0x358   :  { %1473 = vadd.xlane.f32.xlu0 %v1472_v44  ;;  %3447 = vpow2.f32 %v1445_v43 }
 0x35a   :  { %v4107_v45 = vpop.eup %3445 }
 0x35b   :  { %v1396_v48 = vpop.xlane.xlu0 %1395  ;;  %v1478_v55 = vsel %vm1366_vm3, %v4107_v45, 0.0  ;;  %v1405_v3 = vpop.xlane.xlu1 %1404 }
 0x35c   :  { %v1424_v49 = vsub.f32 %v4042_v11, %v1396_v48  ;;  %1479 = vadd.xlane.f32.xlu0 %v1478_v55  ;;  %v1427_v19 = vsub.f32 %v4044_v14, %v1405_v3 }
 0x35e   :  { %v1449_v57 = vmul.f32 1.442695, %v1424_v49 }
 0x360   :  { %3449 = vpow2.f32 %v1449_v57 }
 0x361   :  { %601 = vrot.lane.b32.xlu1 %v3896_v54, %s3655_s0 }
 0x362   :  { %v4114_v58 = vpop.eup %3447 }
 0x363   :  { %v1411_v59 = vpop.xlane.xlu1 %1410  ;;  %v1402_v60 = vpop.xlane.xlu0 %1401  ;;  %v1484_v5 = vsel %vm1366_vm3, %v4114_v58, 0.0 }
 0x364   :  { %v1426_v2 = vsub.f32 %v4050_v28, %v1402_v60  ;;  %1485 = vadd.xlane.f32.xlu0 %v1484_v5  ;;  %v1425_v28 = vsub.f32 %v4036_v4, %v1399_v47  ;;  %v1455_v4 = vmul.f32 1.442695, %v1427_v19  ;;  %v1429_v25 = vsub.f32 %v4052_v29, %v1411_v59 }
 0x365   :  { %v616_v60 = vpack.c.bf16 %v4074_v61, %v4074_v61 }
 0x366   :  { %v1453_v11 = vmul.f32 1.442695, %v1426_v2  ;;  %v1451_v20 = vmul.f32 1.442695, %v1425_v28 }
 0x367   :  { %v1465_v6 = vpop.xlane.xlu1 %1464 }
 0x368   :  { %3451 = vpow2.f32 %v1453_v11 }
 0x369   :  { %3453 = vrcp.f32 %v1465_v6  ;;  %v1702_v6 = vsel %vm1562_vm2, %v616_v60, 0 }
 0x36a   :  { %v4119_v51 = vpop.eup %3449  ;;  %3455 = vpow2.f32 %v1447_v10 }
 0x36b   :  { %v1490_v7 = vsel %vm1366_vm3, %v4119_v51, 0.0  ;;  %3457 = vpow2.f32 %v1451_v20  ;;  %v1408_v35 = vpop.xlane.xlu0 %1407  ;;  %v4173_v57 = vpop.permute.xlu1 %598  ;;  %v619_v20 = vpack.c.bf16 %v4078_v63, %v4078_v63 }
 0x36c   :  { %1491 = vadd.xlane.f32.xlu0 %v1490_v7  ;;  %3459 = vpow2.f32 %v1455_v4  ;;  %v1428_v36 = vsub.f32 %v4062_v46, %v1408_v35 }
 0x36e   :  { %v1457_v42 = vmul.f32 1.442695, %v1428_v36  ;;  %v3317_v36 = vunpack.i.h.bf16 %v3994_v16 }
 0x36f   :  { %v4158_v43 = vpop.permute.xlu0 %595 }
 0x372   :  { %v4124_v9 = vpop.eup %3451 }
 0x373   :  { %v3454_v12 = vpop.eup %3453  ;;  %v1496_v15 = vsel %vm1366_vm3, %v4124_v9, 0.0 }
 0x374   :  { %v1527_v18 = vmul.f32 %v3454_v12, %v4058_v37  ;;  %1497 = vadd.xlane.f32.xlu0 %v1496_v15  ;;  %v1459_v37 = vmul.f32 1.442695, %v1429_v25  ;;  %v4139_v27 = vpop.eup %3455 }
 0x375   :  { %v1487_v14 = vsel %vm1366_vm3, %v4139_v27, 0.0  ;;  %v4143_v22 = vpop.eup %3457 }
 0x376   :  { %v1543_v52 = vpack.c.bf16 %v1527_v18, %v1527_v18  ;;  %3461 = vpow2.f32 %v1459_v37  ;;  %v1493_v23 = vsel %vm1366_vm3, %v4143_v22, 0.0  ;;  %v4147_v32 = vpop.eup %3459 }
 0x377   :  { %v1499_v29 = vsel %vm1366_vm3, %v4147_v32, 0.0  ;;  %3463 = vpow2.f32 %v1457_v42 }
 0x378   :  { %3179 = vmatmul.mubr.msk.bf16.vlgmr.msra.gmra.mrb[28].mxu0 %vm1366_vm3, %v1543_v52 }
 0x379   :  { %3189 = vmatpush3.bf16.msra.mxu0 %v1656_v21  ;;  %3190 = vmatprep.mubr.msk.bf16.mxu0 %vm3660_vm0, %v3659_v1 }
 0x37a   :  { %3200 = vmatprep.subr.bf16.mxu0 %v3659_v1 }
 0x380   :  { %v4153_v34 = vpop.eup %3461 }
 0x381   :  { %v1505_v40 = vsel %vm1366_vm3, %v4153_v34, 0.0  ;;  %v4161_v48 = vpop.eup %3463 }
 0x382   :  { %v1502_v49 = vsel %vm1366_vm3, %v4161_v48, 0.0 }
 0x385   :  { %1488 = vadd.xlane.f32.xlu1 %v1487_v14 }
 0x389   :  { %1494 = vadd.xlane.f32.xlu1 %v1493_v23  ;;  %v621_v23 = vpack.c.bf16 %v3896_v54, %v3896_v54 }
 0x38a   :  { %604 = vrot.lane.b32.xlu0 %v3896_v54, %s3664_s25 }
 0x38b   :  { %v1932_v42 = vsel %vm1562_vm2, %v621_v23, 0 }
 0x38d   :  { %1500 = vadd.xlane.f32.xlu1 %v1499_v29 }
 0x391   :  { %1506 = vadd.xlane.f32.xlu1 %v1505_v40 }
 0x3a0   :  { %v1414_v53 = vpop.xlane.xlu0 %1413 }
 0x3a1   :  { %v1430_v44 = vsub.f32 %v4066_v56, %v1414_v53 }
 0x3a3   :  { %v1461_v47 = vmul.f32 1.442695, %v1430_v44 }
 0x3a5   :  { %3465 = vpow2.f32 %v1461_v47 }
 0x3a9   :  { %1503 = vadd.xlane.f32.xlu0 %v1502_v49  ;;  %v624_v49 = vpack.c.bf16 %v4173_v57, %v4173_v57 }
 0x3af   :  { %v4165_v55 = vpop.eup %3465 }
 0x3b0   :  { %v1508_v46 = vsel %vm1366_vm3, %v4165_v55, 0.0 }
 0x3b1   :  { %1509 = vadd.xlane.f32.xlu1 %v1508_v46 }
 0x3bf   :  { %610 = vrot.lane.b32.xlu0 %v3896_v54, %s3666_s28 }
 0x3c2   :  { %607 = vrot.lane.b32.xlu1 %v3896_v54, %s3665_s27  ;;  %v622_v54 = vpack.c.bf16 %v3317_v36, %v3317_v36 }
 0x3c4   :  { %v1978_v47 = vsel %vm1562_vm2, %v622_v54, 0 }
 0x3d1   :  { %v1468_v56 = vpop.xlane.xlu0 %1467 }
 0x3d2   :  { %3467 = vrcp.f32 %v1468_v56 }
 0x3d9   :  { %v1477_v3 = vpop.xlane.xlu1 %1476 }
 0x3dc   :  { %v3468_v59 = vpop.eup %3467 }
 0x3dd   :  { %v1528_v2 = vmul.f32 %v3468_v59, %v4083_v13  ;;  %v1471_v5 = vpop.xlane.xlu1 %1470  ;;  %v617_v13 = vpack.c.bf16 %v4076_v62, %v4076_v62 }
 0x3de   :  { %3469 = vrcp.f32 %v1471_v5 }
 0x3df   :  { %v1544_v11 = vpack.c.bf16 %v1528_v2, %v1528_v2  ;;  %3471 = vrcp.f32 %v1477_v3  ;;  %v1748_v17 = vsel %vm1562_vm2, %v617_v13, 0  ;;  %v2070_v3 = vsel %vm1562_vm2, %v624_v49, 0 }
 0x3e1   :  { %3185 = vmatmul.mubr.msk.bf16.vlgmr.msra.gmra.mrb[44].mxu1 %vm1366_vm3, %v1544_v11  ;;  %v1483_v7 = vpop.xlane.xlu0 %1482  ;;  %v602_v59 = vpop.permute.xlu1 %601 }
 0x3e2   :  { %3195 = vmatpush3.bf16.msra.mxu1 %v1702_v6  ;;  %3196 = vmatprep.mubr.msk.bf16.mxu1 %vm3660_vm0, %v3659_v1 }
 0x3e3   :  { %3206 = vmatprep.subr.bf16.mxu1 %v3659_v1 }
 0x3e5   :  { %v1474_v8 = vpop.xlane.xlu0 %1473 }
 0x3e6   :  { %3473 = vrcp.f32 %v1474_v8  ;;  %v623_v8 = vpack.c.bf16 %v4158_v43, %v4158_v43 }
 0x3e7   :  { %3475 = vrcp.f32 %v1483_v7 }
 0x3e8   :  { %v3470_v61 = vpop.eup %3469 }
 0x3e9   :  { %v1529_v10 = vmul.f32 %v3470_v61, %v4093_v24  ;;  %v1480_v28 = vpop.xlane.xlu0 %1479  ;;  %v3472_v15 = vpop.eup %3471  ;;  %v618_v24 = vpack.c.bf16 %v4013_v39, %v4013_v39 }
 0x3ea   :  { %3477 = vrcp.f32 %v1480_v28  ;;  %v1531_v18 = vmul.f32 %v3472_v15, %v4089_v26  ;;  %v1840_v26 = vsel %vm1562_vm2, %v619_v20, 0  ;;  %v2024_v28 = vsel %vm1562_vm2, %v623_v8, 0 }
 0x3eb   :  { %v1545_v12 = vpack.c.bf16 %v1529_v10, %v1529_v10  ;;  %v1794_v14 = vsel %vm1562_vm2, %v618_v24, 0  ;;  %v625_v15 = vpack.c.bf16 %v602_v59, %v602_v59 }
 0x3ec   :  { %v1547_v4 = vpack.c.bf16 %v1531_v18, %v1531_v18 }
 0x3ed   :  { %3191 = vmatmul.mubr.msk.bf16.vlgmr.msra.gmra.mrb[32].mxu0 %vm1366_vm3, %v1545_v12 }
 0x3ee   :  { %3201 = vmatpush3.bf16.msra.mxu0 %v1748_v17  ;;  %3202 = vmatprep.mubr.msk.bf16.mxu0 %vm3660_vm0, %v3659_v1 }
 0x3ef   :  { %3212 = vmatprep.subr.bf16.mxu0 %v3659_v1 }
 0x3f0   :  { %v3474_v62 = vpop.eup %3473 }
 0x3f1   :  { %v1530_v19 = vmul.f32 %v3474_v62, %v4102_v38  ;;  %v1486_v52 = vpop.xlane.xlu0 %1485  ;;  %v3476_v25 = vpop.eup %3475  ;;  %v620_v38 = vpack.c.bf16 %v4023_v50, %v4023_v50 }
 0x3f2   :  { %3479 = vrcp.f32 %v1486_v52  ;;  %v1533_v39 = vmul.f32 %v3476_v25, %v4098_v41 }
 0x3f3   :  { %v1546_v21 = vpack.c.bf16 %v1530_v19, %v1530_v19  ;;  %v1886_v35 = vsel %vm1562_vm2, %v620_v38, 0 }
 0x3f4   :  { %v3478_v37 = vpop.eup %3477 }
 0x3f5   :  { %3197 = vmatmul.mubr.msk.bf16.vlgmr.msra.gmra.mrb[48].mxu1 %vm1366_vm3, %v1546_v21  ;;  %3203 = vmatmul.mubr.msk.bf16.vlgmr.msra.gmra.mrb[36].mxu0 %vm1366_vm3, %v1547_v4  ;;  %v1532_v63 = vmul.f32 %v3478_v37, %v4107_v45  ;;  %v1549_v45 = vpack.c.bf16 %v1533_v39, %v1533_v39 }
 0x3f6   :  { %3207 = vmatpush3.bf16.msra.mxu1 %v1794_v14  ;;  %3213 = vmatpush3.bf16.msra.mxu0 %v1840_v26 }
 0x3f7   :  { %3208 = vmatprep.mubr.msk.bf16.mxu1 %vm3660_vm0, %v3659_v1  ;;  %3214 = vmatprep.mubr.msk.bf16.mxu0 %vm3660_vm0, %v3659_v1  ;;  %v1548_v41 = vpack.c.bf16 %v1532_v63, %v1532_v63 }
 0x3f8   :  { %3218 = vmatprep.subr.bf16.mxu1 %v3659_v1  ;;  %3224 = vmatprep.subr.bf16.mxu0 %v3659_v1 }
 0x3f9   :  { %v1492_v29 = vpop.xlane.xlu0 %1491 }
 0x3fa   :  { %3481 = vrcp.f32 %v1492_v29 }
 0x3fc   :  { %v3480_v40 = vpop.eup %3479 }
 0x3fd   :  { %3209 = vmatmul.mubr.msk.bf16.vlgmr.msra.gmra.mrb[52].mxu1 %vm1366_vm3, %v1548_v41  ;;  %3215 = vmatmul.mubr.msk.bf16.vlgmr.msra.gmra.mrb[40].mxu0 %vm1366_vm3, %v1549_v45  ;;  %v1534_v50 = vmul.f32 %v3480_v40, %v4114_v58 }
 0x3fe   :  { %3219 = vmatpush3.bf16.msra.mxu1 %v1886_v35  ;;  %3225 = vmatpush3.bf16.msra.mxu0 %v1932_v42 }
 0x3ff   :  { %3220 = vmatprep.mubr.msk.bf16.mxu1 %vm3660_vm0, %v3659_v1  ;;  %3230 = vmatprep.subr.bf16.mxu1 %v3659_v1  ;;  %v1550_v53 = vpack.c.bf16 %v1534_v50, %v1534_v50 }
 0x400   :  { %3226 = vmatprep.mubr.msk.bf16.mxu0 %vm3660_vm0, %v3659_v1  ;;  %3236 = vmatprep.subr.bf16.mxu0 %v3659_v1 }
 0x401   :  { %v1498_v16 = vpop.xlane.xlu0 %1497 }
 0x402   :  { %3483 = vrcp.f32 %v1498_v16 }
 0x404   :  { %v3482_v44 = vpop.eup %3481 }
 0x405   :  { %3221 = vmatmul.mubr.msk.bf16.vlgmr.msra.gmra.mrb[56].mxu1 %vm1366_vm3, %v1550_v53  ;;  %v1536_v58 = vmul.f32 %v3482_v44, %v4119_v51  ;;  %v605_v60 = vpop.permute.xlu0 %604 }
 0x406   :  { %3231 = vmatpush3.bf16.msra.mxu1 %v1978_v47  ;;  %3232 = vmatprep.mubr.msk.bf16.mxu1 %vm3660_vm0, %v3659_v1  ;;  %v626_v51 = vpack.c.bf16 %v605_v60, %v605_v60 }
 0x407   :  { %3242 = vmatprep.subr.bf16.mxu1 %v3659_v1  ;;  %v1552_v46 = vpack.c.bf16 %v1536_v58, %v1536_v58 }
 0x408   :  { %v2162_v11 = vsel %vm1562_vm2, %v626_v51, 0 }
 0x40c   :  { %v3484_v56 = vpop.eup %3483 }
 0x40d   :  { %3233 = vmatmul.mubr.msk.bf16.vlgmr.msra.gmra.mrb[60].mxu1 %vm1366_vm3, %v1552_v46  ;;  %v1538_v2 = vmul.f32 %v3484_v56, %v4124_v9 }
 0x40e   :  { %3243 = vmatpush3.bf16.msra.mxu1 %v2070_v3  ;;  %3244 = vmatprep.mubr.msk.bf16.mxu1 %vm3660_vm0, %v3659_v1 }
 0x40f   :  { %3254 = vmatprep.subr.bf16.mxu1 %v3659_v1  ;;  %v1554_v57 = vpack.c.bf16 %v1538_v2, %v1538_v2 }
 0x412   :  { %v1489_v5 = vpop.xlane.xlu1 %1488 }
 0x413   :  { %3485 = vrcp.f32 %v1489_v5 }
 0x415   :  { %3245 = vmatmul.mubr.msk.bf16.vlgmr.msra.gmra.mrb[64].mxu1 %vm1366_vm3, %v1554_v57 }
 0x416   :  { %3255 = vmatpush3.bf16.msra.mxu1 %v2162_v11  ;;  %v1495_v6 = vpop.xlane.xlu1 %1494  ;;  %3256 = vmatprep.mubr.msk.bf16.mxu1 %vm3660_vm0, %v3659_v1 }
 0x417   :  { %3487 = vrcp.f32 %v1495_v6  ;;  %3266 = vmatprep.subr.bf16.mxu1 %v3659_v1 }
 0x41a   :  { %v1501_v7 = vpop.xlane.xlu1 %1500 }
 0x41b   :  { %3489 = vrcp.f32 %v1501_v7 }
 0x41d   :  { %v3486_v9 = vpop.eup %3485 }
 0x41e   :  { %v1535_v61 = vmul.f32 %v3486_v9, %v4139_v27  ;;  %v2116_v27 = vsel %vm1562_vm2, %v625_v15, 0 }
 0x420   :  { %v1551_v13 = vpack.c.bf16 %v1535_v61, %v1535_v61 }
 0x421   :  { %v3488_v10 = vpop.eup %3487 }
 0x422   :  { %3227 = vmatmul.mubr.msk.bf16.vlgmr.msra.gmra.mrb[44].mxu0 %vm1366_vm3, %v1551_v13  ;;  %v1537_v12 = vmul.f32 %v3488_v10, %v4143_v22  ;;  %v1507_v22 = vpop.xlane.xlu1 %1506 }
 0x423   :  { %3237 = vmatpush3.bf16.msra.mxu0 %v2024_v28  ;;  %3238 = vmatprep.mubr.msk.bf16.mxu0 %vm3660_vm0, %v3659_v1  ;;  %3491 = vrcp.f32 %v1507_v22 }
 0x424   :  { %3248 = vmatprep.subr.bf16.mxu0 %v3659_v1  ;;  %v1553_v17 = vpack.c.bf16 %v1537_v12, %v1537_v12 }
 0x425   :  { %v3490_v43 = vpop.eup %3489 }
 0x426   :  { %v1539_v18 = vmul.f32 %v3490_v43, %v4147_v32 }
 0x428   :  { %v1555_v62 = vpack.c.bf16 %v1539_v18, %v1539_v18 }
 0x42a   :  { %3239 = vmatmul.mubr.msk.bf16.vlgmr.msra.gmra.mrb[48].mxu0 %vm1366_vm3, %v1553_v17 }
 0x42b   :  { %3249 = vmatpush3.bf16.msra.mxu0 %v2116_v27  ;;  %3250 = vmatprep.mubr.msk.bf16.mxu0 %vm3660_vm0, %v3659_v1 }
 0x42c   :  { %3260 = vmatprep.subr.bf16.mxu0 %v3659_v1 }
 0x42d   :  { %v3492_v19 = vpop.eup %3491 }
 0x42e   :  { %v1541_v32 = vmul.f32 %v3492_v19, %v4153_v34 }
 0x430   :  { %v1557_v38 = vpack.c.bf16 %v1541_v32, %v1541_v32 }
 0x432   :  { %3251 = vmatmul.mubr.msk.bf16.vlgmr.msra.gmra.mrb[52].mxu0 %vm1366_vm3, %v1555_v62 }
 0x433   :  { %3262 = vmatprep.mubr.msk.bf16.mxu0 %vm3660_vm0, %v3659_v1 }
 0x436   :  { %v1504_v24 = vpop.xlane.xlu0 %1503 }
 0x437   :  { %3493 = vrcp.f32 %v1504_v24 }
 0x43a   :  { %v611_v52 = vpop.permute.xlu0 %610 }
 0x43b   :  { %v628_v37 = vpack.c.bf16 %v611_v52, %v611_v52 }
 0x43d   :  { %v2254_v63 = vsel %vm1562_vm2, %v628_v37, 0  ;;  %v3386_v37 = vld [vmem:[#allocation7 + $0x8] sm:$0xff]  }
 0x43e   :  { %v1510_v20 = vpop.xlane.xlu1 %1509 }
 0x43f   :  { %3495 = vrcp.f32 %v1510_v20 }
 0x441   :  { %v3494_v21 = vpop.eup %3493 }
 0x442   :  { %v608_v4 = vpop.permute.xlu1 %607  ;;  %v1540_v25 = vmul.f32 %v3494_v21, %v4161_v48  ;;  %v3385_v21 = vld [vmem:[#allocation7] sm:$0xff]  }
 0x443   :  { %v627_v14 = vpack.c.bf16 %v608_v4, %v608_v4 }
 0x444   :  { %v1556_v39 = vpack.c.bf16 %v1540_v25, %v1540_v25 }
 0x445   :  { %v2208_v26 = vsel %vm1562_vm2, %v627_v14, 0 }
 0x446   :  { %3261 = vmatpush3.bf16.msra.mxu0 %v2208_v26  ;;  %3257 = vmatmul.mubr.msk.bf16.vlgmr.msra.gmra.mrb[68].mxu1 %vm1366_vm3, %v1556_v39  ;;  %v3387_v26 = vld [vmem:[#allocation7 + $0x10] sm:$0xff]  }
 0x447   :  { %3272 = vmatprep.subr.bf16.mxu0 %v3659_v1  ;;  %3267 = vmatpush3.bf16.msra.mxu1 %v2254_v63 }
 0x448   :  { %3268 = vmatprep.mubr.msk.bf16.mxu1 %vm3660_vm0, %v3659_v1 }
 0x449   :  { %v3496_v34 = vpop.eup %3495  ;;  %3263 = vmatmul.mubr.msk.bf16.vlgmr.msra.gmra.mrb[56].mxu0 %vm1366_vm3, %v1557_v38 }
 0x44a   :  { %v1542_v48 = vmul.f32 %v3496_v34, %v4165_v55  ;;  %3288 = vmatprep.mubr.msk.bf16.mxu0 %vm3660_vm0, %v3659_v1  ;;  %3273 = vmatpush3.bf16.msra.mxu0 %v3385_v21 }
 0x44b   :  { %v4274_v23 = vpop.f32.mrb[28].mxu0  ;;  %3274 = vmatprep.subr.bf16.mxu0 %v3659_v1 }
 0x44c   :  { %v1558_v29 = vpack.c.bf16 %v1542_v48, %v1542_v48  ;;  %v3180_v41 = vpop.f32.mrb[29].mxu0  ;;  %v3388_v48 = vld [vmem:[#allocation7 + $0x18] sm:$0xff]  }
 0x44d   :  { %v1603_v45 = vpop.f32.mrb[30].mxu0  ;;  %v3389_v41 = vld [vmem:[#allocation7 + $0x20] sm:$0xff]  }
 0x44e   :  { %v3181_v40 = vpop.f32.mrb[31].mxu0  ;;  %3269 = vmatmul.mubr.msk.bf16.vlgmr.msra.gmra.mrb[72].mxu1 %vm1366_vm3, %v1558_v29  ;;  %3275 = vmatpush3.bf16.msra.mxu0 %v3386_v37  ;;  %v3390_v45 = vld [vmem:[#allocation7 + $0x28] sm:$0xff]  }
 0x44f   :  { %2633 = vmatprep.mubr.bf16.mxu1 %v3658_v0  ;;  %3276 = vmatprep.subr.bf16.mxu0 %v3659_v1  ;;  %v3391_v40 = vld [vmem:[#allocation7 + $0x30] sm:$0xff]  }
 0x452   :  { %3277 = vmatpush3.bf16.msra.mxu0 %v3387_v26 }
 0x453   :  { %3278 = vmatprep.subr.bf16.mxu0 %v3659_v1 }
 0x456   :  { %3279 = vmatpush3.bf16.msra.mxu0 %v3388_v48 }
 0x457   :  { %3280 = vmatprep.subr.bf16.mxu0 %v3659_v1 }
 0x45a   :  { %3281 = vmatpush3.bf16.msra.mxu0 %v3389_v41 }
 0x45b   :  { %3282 = vmatprep.subr.bf16.mxu0 %v3659_v1 }
 0x45e   :  { %3283 = vmatpush3.bf16.msra.mxu0 %v3390_v45  ;;  %v3505_v45 = vld [vmem:[#allocation2] sm:$0xff] }
 0x45f   :  { %3284 = vmatprep.subr.bf16.mxu0 %v3659_v1 }
 0x462   :  { %3285 = vmatpush3.bf16.msra.mxu0 %v3391_v40 }
 0x463   :  { %3286 = vmatprep.subr.bf16.mxu0 %v3659_v1 }
 0x4b4   :  { %v1646_v35 = vpop.f32.mrb[44].mxu1 }
 0x4b5   :  { %v3186_v36 = vpop.f32.mrb[45].mxu1 }
 0x4b6   :  { %v1649_v42 = vpop.f32.mrb[46].mxu1  ;;  %v3392_v36 = vld [vmem:[#allocation7 + $0x38] sm:$0xff]  }
 0x4b7   :  { %v3187_v50 = vpop.f32.mrb[47].mxu1  ;;  %3287 = vmatpush3.bf16.msra.mxu0 %v3392_v36 }
 0x4c0   :  { %v1692_v54 = vpop.f32.mrb[32].mxu0 }
 0x4c1   :  { %v3192_v16 = vpop.f32.mrb[33].mxu0 }
 0x4c2   :  { %v1695_v55 = vpop.f32.mrb[34].mxu0 }
 0x4c3   :  { %v3193_v53 = vpop.f32.mrb[35].mxu0 }
 0x4c8   :  { %v1738_v44 = vpop.f32.mrb[48].mxu1  ;;  %v1784_v47 = vpop.f32.mrb[36].mxu0 }
 0x4c9   :  { %v3198_v58 = vpop.f32.mrb[49].mxu1  ;;  %v3204_v49 = vpop.f32.mrb[37].mxu0 }
 0x4ca   :  { %v1741_v46 = vpop.f32.mrb[50].mxu1  ;;  %v1787_v56 = vpop.f32.mrb[38].mxu0 }
 0x4cb   :  { %v3199_v3 = vpop.f32.mrb[51].mxu1  ;;  %v3205_v59 = vpop.f32.mrb[39].mxu0 }
 0x4d0   :  { %v4278_v60 = vpop.f32.mrb[52].mxu1  ;;  %v4280_v2 = vpop.f32.mrb[40].mxu0 }
 0x4d1   :  { %v3210_v0 = vpop.f32.mrb[53].mxu1  ;;  %v3216_v51 = vpop.f32.mrb[41].mxu0 }
 0x4d2   :  { %v1833_v5 = vpop.f32.mrb[54].mxu1  ;;  %v1879_v57 = vpop.f32.mrb[42].mxu0 }
 0x4d3   :  { %v3211_v11 = vpop.f32.mrb[55].mxu1  ;;  %v3217_v6 = vpop.f32.mrb[43].mxu0 }
 0x4d8   :  { %v4282_v7 = vpop.f32.mrb[56].mxu1 }
 0x4d9   :  { %v3222_v9 = vpop.f32.mrb[57].mxu1 }
 0x4da   :  { %v1925_v8 = vpop.f32.mrb[58].mxu1 }
 0x4db   :  { %v3223_v61 = vpop.f32.mrb[59].mxu1 }
 0x4e0   :  { %v2014_v13 = vpop.f32.mrb[60].mxu1 }
 0x4e1   :  { %v3318_v10 = vpack.i.bf16 %v2014_v13, %v1646_v35  ;;  %v3234_v28 = vpop.f32.mrb[61].mxu1 }
 0x4e2   :  { %v2017_v12 = vpop.f32.mrb[62].mxu1 }
 0x4e3   :  { %3319 = vrot.lane.b32.xlu1 %v3318_v10, %s3666_s28  ;;  %v3235_v15 = vpop.f32.mrb[63].mxu1 }
 0x4e8   :  { %v2106_v17 = vpop.f32.mrb[64].mxu1 }
 0x4e9   :  { %v3328_v43 = vpack.i.bf16 %v2106_v17, %v1738_v44  ;;  %v3246_v27 = vpop.f32.mrb[65].mxu1 }
 0x4ea   :  { %v2109_v18 = vpop.f32.mrb[66].mxu1 }
 0x4eb   :  { %3329 = vrot.lane.b32.xlu1 %v3328_v43, %s3664_s25  ;;  %v3247_v62 = vpop.f32.mrb[67].mxu1 }
 0x4f5   :  { %v4286_v22 = vpop.f32.mrb[44].mxu0 }
 0x4f6   :  { %v3228_v24 = vpop.f32.mrb[45].mxu0 }
 0x4f7   :  { %v1971_v20 = vpop.f32.mrb[46].mxu0 }
 0x4f8   :  { %v3229_v19 = vpop.f32.mrb[47].mxu0 }
 0x4fd   :  { %v2060_v52 = vpop.f32.mrb[48].mxu0 }
 0x4fe   :  { %v3323_v4 = vpack.i.bf16 %v2060_v52, %v1692_v54  ;;  %v3240_v32 = vpop.f32.mrb[49].mxu0 }
 0x4ff   :  { %v2063_v25 = vpop.f32.mrb[50].mxu0 }
 0x500   :  { %3324 = vrot.lane.b32.xlu0 %v3323_v4, %s3665_s27  ;;  %v3241_v14 = vpop.f32.mrb[51].mxu0 }
 0x505   :  { %v2152_v39 = vpop.f32.mrb[52].mxu0 }
 0x506   :  { %v3333_v63 = vpack.i.bf16 %v2152_v39, %v1784_v47  ;;  %v3252_v38 = vpop.f32.mrb[53].mxu0  ;;  %v2910_v39 = vld [vmem:[%s4358_s4] ss:$0 sm:$0xff] }
 0x507   :  { %v2155_v34 = vpop.f32.mrb[54].mxu0 }
 0x508   :  { %3334 = vrot.lane.b32.xlu0 %v3333_v63, %s3655_s0  ;;  %v3253_v29 = vpop.f32.mrb[55].mxu0 }
 0x519   :  { %v2198_v35 = vpop.f32.mrb[68].mxu1 }
 0x51a   :  { %v3338_v42 = vpack.i.bf16 %v2198_v35, %v4278_v60  ;;  %v3258_v50 = vpop.f32.mrb[69].mxu1  ;;  %v3506_v35 = vld [vmem:[#allocation2 + $0x8] sm:$0xff] }
 0x51b   :  { %v2201_v54 = vpop.f32.mrb[70].mxu1  ;;  %v3395_v50 = vld [vmem:[#allocation8 + $0x4] ss:$8 sps:$4 sm:$0xff]  }
 0x51c   :  { %v2244_v16 = vpop.f32.mrb[56].mxu0  ;;  %3339 = vrot.lane.b32.xlu1 %v3338_v42, %s3663_s2  ;;  %v3259_v53 = vpop.f32.mrb[71].mxu1  ;;  %v3393_v42 = vld [vmem:[#allocation8] ss:$8 sps:$4 sm:$0xff]   ;;  %v3398_v54 = vld [vmem:[#allocation8 + $0x14] ss:$8 sps:$4 sm:$0xff]   ;;  %2601 = vmatprep.subr.bf16.mxu1 %v3395_v50 }
 0x51d   :  { %v3343_v55 = vpack.i.bf16 %v2244_v16, %v4280_v2  ;;  %v3264_v44 = vpop.f32.mrb[57].mxu0  ;;  %2602 = vmatpush1.bf16.msra.mxu1 %v3393_v42  ;;  %v3396_v16 = vld [vmem:[#allocation8 + $0x10] ss:$8 sps:$4 sm:$0xff]  }
 0x51e   :  { %v2247_v47 = vpop.f32.mrb[58].mxu0  ;;  %2603 = vmatprep.subr.bf16.mxu1 %v3398_v54 }
 0x51f   :  { %3344 = vrot.lane.b32.xlu0 %v3343_v55, %s3661_s22  ;;  %v3265_v58 = vpop.f32.mrb[59].mxu0 }
 0x521   :  { %v2290_v49 = vpop.f32.mrb[72].mxu1  ;;  %2604 = vmatpush1.bf16.msra.mxu1 %v3396_v16 }
 0x522   :  { %v3348_v1 = vpack.i.bf16 %v2290_v49, %v4282_v7  ;;  %v3270_v46 = vpop.f32.mrb[73].mxu1 }
 0x523   :  { %v2293_v56 = vpop.f32.mrb[74].mxu1 }
 0x524   :  { %3349 = vrot.lane.b32.xlu1 %v3348_v1, %s3662_s24  ;;  %v3271_v3 = vpop.f32.mrb[75].mxu1  ;;  %v3401_v56 = vld [vmem:[#allocation8 + $0x24] ss:$8 sps:$4 sm:$0xff]  }
 0x525   :  { %v3399_v3 = vld [vmem:[#allocation8 + $0x20] ss:$8 sps:$4 sm:$0xff]   ;;  %2605 = vmatprep.subr.bf16.mxu1 %v3401_v56 }
 0x526   :  { %2606 = vmatpush1.bf16.msra.mxu1 %v3399_v3 }
 0x555   :  { %v3320_v59 = vpop.permute.xlu1 %3319 }
 0x556   :  { %v3322_v2 = vunpack.i.h.bf16 %v3320_v59  ;;  %v3321_v51 = vunpack.i.l.bf16 %v3320_v59  ;;  %v3404_v59 = vld [vmem:[#allocation8 + $0x34] ss:$8 sps:$4 sm:$0xff]  }
 0x557   :  { %2607 = vmatprep.subr.bf16.mxu1 %v3404_v59 }
 0x558   :  { %v2365_v9 = vsel %vm629_vm1, %v4286_v22, %v3322_v2  ;;  %v2324_v7 = vsel %vm629_vm1, %v4274_v23, %v3321_v51  ;;  %v3405_v2 = vld [vmem:[#allocation8 + $0x40] ss:$8 sps:$4 sm:$0xff]   ;;  %v3410_v51 = vld [vmem:[#allocation8 + $0x54] ss:$8 sps:$4 sm:$0xff]  }
 0x55d   :  { %v3330_v0 = vpop.permute.xlu1 %3329 }
 0x55e   :  { %v3332_v12 = vunpack.i.h.bf16 %v3330_v0  ;;  %v3331_v15 = vunpack.i.l.bf16 %v3330_v0  ;;  %v3407_v0 = vld [vmem:[#allocation8 + $0x44] ss:$8 sps:$4 sm:$0xff]  }
 0x572   :  { %v3325_v60 = vpop.permute.xlu0 %3324 }
 0x573   :  { %v3327_v57 = vunpack.i.h.bf16 %v3325_v60  ;;  %v3326_v11 = vunpack.i.l.bf16 %v3325_v60  ;;  %v3402_v60 = vld [vmem:[#allocation8 + $0x30] ss:$8 sps:$4 sm:$0xff]  }
 0x574   :  { %2608 = vmatpush1.bf16.msra.mxu1 %v3402_v60 }
 0x575   :  { %v2326_v61 = vsel %vm2325_vm4, %v2324_v7, %v3326_v11  ;;  %v2366_v13 = vsel %vm2325_vm4, %v2365_v9, %v3327_v57  ;;  %2609 = vmatprep.subr.bf16.mxu1 %v3407_v0  ;;  %v3411_v57 = vld [vmem:[#allocation8 + $0x60] ss:$8 sps:$4 sm:$0xff]   ;;  %v3413_v11 = vld [vmem:[#allocation8 + $0x64] ss:$8 sps:$4 sm:$0xff]   ;;  %v3414_v9 = vld [vmem:[#allocation8 + $0x70] ss:$8 sps:$4 sm:$0xff]  }
 0x576   :  { %v2328_v62 = vsel %vm2327_vm5, %v2326_v61, %v3331_v15  ;;  %v2367_v24 = vsel %vm2327_vm5, %v2366_v13, %v3332_v12  ;;  %v3417_v7 = vld [vmem:[#allocation10 + $0x40] sm:$0xff]   ;;  %v3419_v61 = vld [vmem:[#allocation10 + $0x48] sm:$0xff]   ;;  %v3423_v12 = vld [vmem:[#allocation10 + $0x58] sm:$0xff]  }
 0x577   :  { %3038 = vmatprep.subr.bf16.mxu0 %v3417_v7  ;;  %v3420_v13 = vld [vmem:[#allocation10 + $0x8] sm:$0xff]   ;;  %v3424_v15 = vld [vmem:[#allocation10 + $0x18] sm:$0xff]  }
 0x578   :  { %2610 = vmatpush1.bf16.msra.mxu1 %v3405_v2 }
 0x579   :  { %2611 = vmatprep.subr.bf16.mxu1 %v3410_v51 }
 0x57a   :  { %v3335_v5 = vpop.permute.xlu0 %3334 }
 0x57b   :  { %v3337_v10 = vunpack.i.h.bf16 %v3335_v5  ;;  %v3336_v28 = vunpack.i.l.bf16 %v3335_v5  ;;  %v3408_v5 = vld [vmem:[#allocation8 + $0x50] ss:$8 sps:$4 sm:$0xff]  }
 0x57c   :  { %2612 = vmatpush1.bf16.msra.mxu1 %v3408_v5 }
 0x57d   :  { %v2330_v22 = vsel %vm2329_vm6, %v2328_v62, %v3336_v28  ;;  %v2368_v23 = vsel %vm2329_vm6, %v2367_v24, %v3337_v10  ;;  %2613 = vmatprep.subr.bf16.mxu1 %v3413_v11  ;;  %v3421_v10 = vld [vmem:[#allocation10 + $0x50] sm:$0xff]  }
 0x57e   :  { %v3422_v28 = vld [vmem:[#allocation10 + $0x10] sm:$0xff]  }
 0x580   :  { %2614 = vmatpush1.bf16.msra.mxu1 %v3411_v57 }
 0x58e   :  { %v3340_v6 = vpop.permute.xlu1 %3339 }
 0x58f   :  { %v3342_v17 = vunpack.i.h.bf16 %v3340_v6  ;;  %v3341_v43 = vunpack.i.l.bf16 %v3340_v6  ;;  %v3416_v6 = vld [vmem:[#allocation8 + $0x74] ss:$8 sps:$4 sm:$0xff]  }
 0x590   :  { %2615 = vmatprep.subr.bf16.mxu1 %v3416_v6 }
 0x591   :  { %v3345_v8 = vpop.permute.xlu0 %3344  ;;  %v2369_v19 = vsel %vm2331_vm7, %v2368_v23, %v3342_v17  ;;  %v2332_v52 = vsel %vm2331_vm7, %v2330_v22, %v3341_v43  ;;  %2616 = vmatpush1.bf16.msra.mxu1 %v3414_v9  ;;  %v3425_v17 = vld [vmem:[#allocation10 + $0x60] sm:$0xff]  }
 0x592   :  { %v3347_v27 = vunpack.i.h.bf16 %v3345_v8  ;;  %v3346_v18 = vunpack.i.l.bf16 %v3345_v8  ;;  %v3418_v8 = vld [vmem:[#allocation10] sm:$0xff]  }
 0x593   :  { %v3426_v43 = vld [vmem:[#allocation10 + $0x20] sm:$0xff]  }
 0x594   :  { %v2334_v32 = vsel %vm2333_vm8, %v2332_v52, %v3346_v18  ;;  %v2370_v25 = vsel %vm2333_vm8, %v2369_v19, %v3347_v27  ;;  %v3427_v27 = vld [vmem:[#allocation10 + $0x68] sm:$0xff]  }
 0x596   :  { %v3350_v20 = vpop.permute.xlu1 %3349 }
 0x597   :  { %v3352_v21 = vunpack.i.h.bf16 %v3350_v20  ;;  %v3351_v4 = vunpack.i.l.bf16 %v3350_v20 }
 0x599   :  { %v2371_v37 = vsel %vm2335_vm9, %v2370_v25, %v3352_v21  ;;  %v2336_v14 = vsel %vm2335_vm9, %v2334_v32, %v3351_v4  ;;  %v2919_v21 = vld [vmem:[%s4359_s5] ss:$0 sm:$0xff] }
 0x59a   :  { %v2372_v26 = vpack.c.bf16 %v2371_v37, %v2336_v14  ;;  %v2920_v37 = vld [vmem:[%s4360_s6] ss:$0 sm:$0xff] }
 0x59c   :  { %3289 = vmatmul.mubr.bf16.vlgmr.msra.gmra.mrb[60].mxu0 %v2372_v26 }
 0x59d   :  { %3039 = vmatpush3.bf16.msra.mxu0 %v3418_v8 }
 0x59e   :  { %3040 = vmatprep.subr.bf16.mxu0 %v3419_v61 }
 0x5a1   :  { %3041 = vmatpush3.bf16.msra.mxu0 %v3420_v13 }
 0x5a2   :  { %3042 = vmatprep.subr.bf16.mxu0 %v3421_v10 }
 0x5a5   :  { %3043 = vmatpush3.bf16.msra.mxu0 %v3422_v28 }
 0x5a6   :  { %3044 = vmatprep.subr.bf16.mxu0 %v3423_v12 }
 0x5a9   :  { %3045 = vmatpush3.bf16.msra.mxu0 %v3424_v15 }
 0x5aa   :  { %3046 = vmatprep.subr.bf16.mxu0 %v3425_v17 }
 0x5ad   :  { %3047 = vmatpush3.bf16.msra.mxu0 %v3426_v43 }
 0x5ae   :  { %3048 = vmatprep.subr.bf16.mxu0 %v3427_v27 }
 0x66f   :  { %v2461_v63 = vpop.f32.mrb[60].mxu0 }
 0x670   :  { %v2462_v38 = vadd.f32 %v2910_v39, %v2461_v63  ;;  %v3290_v34 = vpop.f32.mrb[61].mxu0 }
 0x671   :  { %v2464_v48 = vpop.f32.mrb[62].mxu0  ;;  %v3429_v34 = vld [vmem:[#allocation10 + $0x70] sm:$0xff]  }
 0x672   :  { %v2465_v29 = vadd.f32 %v2910_v39, %v2464_v48  ;;  %v3291_v41 = vpop.f32.mrb[63].mxu0  ;;  %v2468_v40 = vadd.f32 %v3505_v45, %v2462_v38  ;;  %v3428_v38 = vld [vmem:[#allocation10 + $0x28] sm:$0xff]   ;;  %v3430_v48 = vld [vmem:[#allocation10 + $0x30] sm:$0xff]  }
 0x673   :  { %3049 = vmatpush3.bf16.msra.mxu0 %v3428_v38  ;;  %v3432_v41 = vld [vmem:[#allocation10 + $0x38] sm:$0xff]   ;;  %v182_v45 = vld [vmem:[%s4362_s8] sm:$0x3] }
 0x674   :  { %2470 = vadd.xlane.f32.xlu0 %v2468_v40  ;;  %v2469_v36 = vadd.f32 %v3506_v35, %v2465_v29  ;;  %3050 = vmatprep.subr.bf16.mxu0 %v3429_v34  ;;  %v3431_v29 = vld [vmem:[#allocation10 + $0x78] sm:$0xff]   ;;  %v2518_v35 = vrot.slane %v182_v45, %v228_v31 }
 0x676   :  { %2472 = vadd.xlane.f32.xlu1 %v2469_v36 }
 0x677   :  { %3051 = vmatpush3.bf16.msra.mxu0 %v3430_v48 }
 0x678   :  { %3052 = vmatprep.subr.bf16.mxu0 %v3431_v29 }
 0x67b   :  { %3053 = vmatpush3.bf16.msra.mxu0 %v3432_v41 }
 0x701   :  { %v2471_v55 = vpop.xlane.xlu0 %2470 }
 0x702   :  { %v2475_v53 = vmul.f32 0.0078125, %v2471_v55 }
 0x703   :  { %v2473_v44 = vpop.xlane.xlu1 %2472 }
 0x704   :  { %v2477_v47 = vsub.f32 %v2468_v40, %v2475_v53  ;;  %v2476_v58 = vmul.f32 0.0078125, %v2473_v44  ;;  %v2514_v40 = vrot.slane %v182_v45, %v224_v33 }
 0x706   :  { %v4312_v49 = vsub.f32 %v2469_v36, %v2476_v58  ;;  %v2479_v1 = vmul.f32 %v2477_v47, %v2477_v47 }
 0x708   :  { %2481 = vadd.xlane.f32.xlu0 %v2479_v1  ;;  %v2480_v46 = vmul.f32 %v4312_v49, %v4312_v49 }
 0x70c   :  { %2483 = vadd.xlane.f32.xlu0 %v2480_v46 }
 0x795   :  { %v2482_v18 = vpop.xlane.xlu0 %2481 }
 0x796   :  { %v2485_v62 = vmul.f32 0.0078125, %v2482_v18 }
 0x798   :  { %v2487_v24 = vadd.f32 1e-05, %v2485_v62  ;;  %v2954_v62 = vld [vmem:[%s4365_s11] ss:$0 sm:$0xff] }
 0x799   :  { %v2484_v22 = vpop.xlane.xlu0 %2483 }
 0x79a   :  { %3497 = vrsqrt.f32 %v2487_v24  ;;  %v2486_v23 = vmul.f32 0.0078125, %v2484_v22 }
 0x79c   :  { %v2488_v20 = vadd.f32 1e-05, %v2486_v23  ;;  %v2955_v23 = vld [vmem:[%s4366_s12] ss:$0 sm:$0xff] }
 0x79e   :  { %3499 = vrsqrt.f32 %v2488_v20 }
 0x7a4   :  { %v3498_v19 = vpop.eup %3497 }
 0x7a5   :  { %v2491_v52 = vmul.f32 %v3498_v19, %v2477_v47 }
 0x7a7   :  { %v2499_v25 = vmul.f32 %v2919_v21, %v2491_v52 }
 0x7a8   :  { %v3500_v4 = vpop.eup %3499 }
 0x7a9   :  { %v2492_v32 = vmul.f32 %v3500_v4, %v4312_v49  ;;  %v2507_v26 = vadd.f32 %v2920_v37, %v2499_v25 }
 0x7ab   :  { %v2500_v14 = vmul.f32 %v2919_v21, %v2492_v32 }
 0x7ad   :  { %v2508_v39 = vadd.f32 %v2920_v37, %v2500_v14 }
 0x7af   :  { %v2509_v63 = vpack.c.bf16 %v2508_v39, %v2507_v26 }
 0x7b1   :  { %2634 = vmatmul.mubr.bf16.vlgmr.msra.gmra.mrb[76].mxu1 %v2509_v63 }
 0x884   :  { %v2635_v36 = vpop.f32.mrb[76].mxu1 }
 0x885   :  { %v2636_v42 = vadd.f32 %v2635_v36, %v2514_v40  ;;  %v2637_v50 = vpop.f32.mrb[77].mxu1 }
 0x886   :  { %v2638_v54 = vadd.f32 %v2637_v50, %v2518_v35  ;;  %v2639_v16 = vpop.f32.mrb[78].mxu1 }
 0x887   :  { %v2640_v55 = vadd.f32 %v2639_v16, %v2514_v40  ;;  %v2641_v53 = vpop.f32.mrb[79].mxu1  ;;  %v2644_v47 = vmax.f32 %v2636_v42, 0.0 }
 0x888   :  { %v2642_v44 = vadd.f32 %v2641_v53, %v2518_v35  ;;  %v2645_v49 = vmax.f32 %v2638_v54, 0.0 }
 0x889   :  { %v2646_v58 = vmax.f32 %v2640_v55, 0.0 }
 0x88a   :  { %v2647_v1 = vmax.f32 %v2642_v44, 0.0 }
 0x88b   :  { %v2648_v46 = vpack.c.bf16 %v2646_v58, %v2644_v47 }
 0x88c   :  { %v2649_v56 = vpack.c.bf16 %v2647_v1, %v2645_v49 }
 0x88e   :  { %2784 = vmatprep.mubr.bf16.mxu0 %v2649_v56 }
 0x88f   :  { %2785 = vmatmul.mubr.bf16.vlgmr.msra.gmra.mrb[64].mxu0 %v2648_v46 }
 0x962   :  { %v3054_v33 = vpop.f32.mrb[64].mxu0 }
 0x963   :  { %v3055_v31 = vpop.f32.mrb[65].mxu0 }
 0x964   :  { %v3056_v3 = vadd.f32 %v3055_v31, %v3054_v33  ;;  %v3057_v59 = vpop.f32.mrb[66].mxu0 }
 0x965   :  { %v3058_v60 = vpop.f32.mrb[67].mxu0 }
 0x966   :  { %v2787_v0 = vadd.f32 %v3056_v3, %v2937_v30  ;;  %v3059_v2 = vadd.f32 %v3058_v60, %v3057_v59 }
 0x968   :  { %v2790_v51 = vadd.f32 %v3059_v2, %v2937_v30  ;;  %v2793_v5 = vadd.f32 %v2787_v0, %v2507_v26 }
 0x96a   :  { %2795 = vadd.xlane.f32.xlu1 %v2793_v5  ;;  %v2794_v57 = vadd.f32 %v2790_v51, %v2508_v39 }
 0x96c   :  { %2797 = vadd.xlane.f32.xlu0 %v2794_v57 }
 0x9f7   :  { %v2796_v11 = vpop.xlane.xlu1 %2795 }
 0x9f8   :  { %v2799_v6 = vmul.f32 0.0078125, %v2796_v11 }
 0x9f9   :  { %v2798_v9 = vpop.xlane.xlu0 %2797 }
 0x9fa   :  { %v2801_v7 = vsub.f32 %v2793_v5, %v2799_v6  ;;  %v2800_v8 = vmul.f32 0.0078125, %v2798_v9 }
 0x9fc   :  { %v2802_v61 = vsub.f32 %v2794_v57, %v2800_v8  ;;  %v2803_v13 = vmul.f32 %v2801_v7, %v2801_v7 }
 0x9fe   :  { %2805 = vadd.xlane.f32.xlu1 %v2803_v13  ;;  %v2804_v10 = vmul.f32 %v2802_v61, %v2802_v61 }
 0xa00   :  { %2807 = vadd.xlane.f32.xlu0 %v2804_v10 }
 0xa8b   :  { %v2806_v28 = vpop.xlane.xlu1 %2805 }
 0xa8c   :  { %v2809_v12 = vmul.f32 0.0078125, %v2806_v28 }
 0xa8d   :  { %v2808_v15 = vpop.xlane.xlu0 %2807 }
 0xa8e   :  { %v2811_v17 = vadd.f32 1e-05, %v2809_v12  ;;  %v2810_v43 = vmul.f32 0.0078125, %v2808_v15 }
 0xa90   :  { %3501 = vrsqrt.f32 %v2811_v17  ;;  %v2812_v27 = vadd.f32 1e-05, %v2810_v43 }
 0xa92   :  { %3503 = vrsqrt.f32 %v2812_v27 }
 0xa9a   :  { %v3502_v18 = vpop.eup %3501 }
 0xa9b   :  { %v2815_v24 = vmul.f32 %v3502_v18, %v2801_v7 }
 0xa9c   :  { %v3504_v22 = vpop.eup %3503 }
 0xa9d   :  { %v2816_v20 = vmul.f32 %v3504_v22, %v2802_v61  ;;  %v2823_v19 = vmul.f32 %v2954_v62, %v2815_v24 }
 0xa9f   :  { %v2824_v52 = vmul.f32 %v2954_v62, %v2816_v20  ;;  %v2831_v21 = vadd.f32 %v2955_v23, %v2823_v19 }
 0xaa1   :  { %v2832_v4 = vadd.f32 %v2955_v23, %v2824_v52  ;;  %2833 = vst [vmem:[#allocation11] sm:$0xff] %v2831_v21 }
 0xaa3   :  { %2834 = vst [vmem:[#allocation11 + $0x8] sm:$0xff] %v2832_v4 }
 0xaa4   :  { %3628 = shalt.err (!%p3625_p2)
}
 0xaa5   :  { %s3629_s12 = scalar_lea.hbm %s4367_s13, 256 }
 0xaa6   :  { %p3630_p3 = scmp.ne.s32.totalorder %s4367_s13, %s3629_s12  ;;  %p3633_p4 = scmp.lt.u32.totalorder %s3629_s12, %s4367_s13 }
 0xaa8   :  { %p3635_p5 = pnand %p3633_p4, %p3630_p3 }
 0xaaa   :  { %3638 = shalt.err (!%p3635_p5)
}
 0xaab   :  { %2846 = dma.vmem_to_hbm [thread:$0]  %s2841_s20, 256, %s4367_s13, [#allocation4], %s3652_s26, %s3652_s26, %s3653_s17  }
 0xaac   :  { %3645 = dma.done.wait [#allocation4], 256  }
 0xaad   :  { %3646 = vsyncadd [#allocation4], 4294967040 }
 0xaae   :  { %2850 = vsyncpa [#allocation3], 1 }
 0xaaf   :  { %2851 = vsyncpa [#allocation6], 1 }
 0xab0   :  { %2852 = vsyncpa [#allocation9], 1 }
 0xab1   :  { %2853 = vsyncpa [#allocation4], 1 }

</bundles_post_ra>
